<compile_context>
chip_gen: v6e
topology: v6e:2x2x1
jax: 0.10.0
libtpu: 0.0.40
codegen_flags: <defaults>
</compile_context>

<pallas_src>
import math

import numpy as np
import jax
import jax.numpy as jnp
from jax import lax
from jax.experimental import pallas as pl
from jax.experimental.pallas import tpu as pltpu

C1 = 0.01 ** 2
C2 = 0.03 ** 2


# --------------------------------------------------------------------------- #
# Kernel
# --------------------------------------------------------------------------- #
def _ssim_kernel(x_ref, y_ref, vrb_ref, wrn_ref, o_ref):
    """One grid step: B row-stacked (H, We) planes, We = G*W lane-packed.

    x_ref, y_ref : (B*H, We)   unpadded pixels
    vrb_ref      : (B*Ho, B*H) block-diag "reflect-pad + vertical box-sum"
    wrn_ref      : (We, Woe)   block-diag "reflect-pad + horizontal box-sum",
                               pre-scaled by 1/ws^2 (AvgPool normalization)
    o_ref        : (B*Ho, Woe) SSIM loss map
    """
    x = x_ref[...].astype(jnp.float32)
    y = y_ref[...].astype(jnp.float32)
    vrb = vrb_ref[...]
    wrn = wrn_ref[...]

    def pool(a):
        # ReflectionPad2d + AvgPool2d(ws, 1) as two MXU contractions.
        t = jnp.dot(a, wrn, preferred_element_type=jnp.float32,
                    precision=lax.Precision.HIGHEST)
        return jnp.dot(vrb, t, preferred_element_type=jnp.float32,
                       precision=lax.Precision.HIGHEST)

    # Each elementwise product is consumed by its pool() immediately, so the
    # peak live set stays at ~one (B*H, We) temporary besides x and y.
    mu_x = pool(x)
    mu_y = pool(y)
    sigma_x = pool(x * x) - mu_x * mu_x
    sigma_y = pool(y * y) - mu_y * mu_y
    sigma_xy = pool(x * y) - mu_x * mu_y

    ssim_n = (2.0 * mu_x * mu_y + C1) * (2.0 * sigma_xy + C2)
    ssim_d = (mu_x * mu_x + mu_y * mu_y + C1) * (sigma_x + sigma_y + C2)
    # EUP approx reciprocal + one Newton step (~f32 accurate; ssim_d >= C1*C2 > 0).
    r = pl.reciprocal(ssim_d, approx=True)
    r = r * (2.0 - ssim_d * r)
    out = jnp.clip((1.0 - ssim_n * r) * 0.5, 0.0, 1.0)
    o_ref[...] = out.astype(o_ref.dtype)


# --------------------------------------------------------------------------- #
# Host-side helpers
# --------------------------------------------------------------------------- #
def _lcm(a, b):
    return a * b // math.gcd(a, b)


def _reflect_box_matrix(n_src, ws):
    """M (n_out, n_src): M[i, r] = #{p in [i, i+ws) : reflect(p) == r}.

    reflect() is torch ReflectionPad indexing with pad = (ws-1)//2, so
    (M @ v) equals the stride-1 ws-window sum of the reflection-padded v.
    """
    pad = (ws - 1) // 2
    n_out = n_src + 2 * pad - ws + 1
    m = np.zeros((n_out, n_src), np.float32)
    for i in range(n_out):
        for p in range(i, i + ws):
            s = p - pad
            if s < 0:
                s = -s
            if s >= n_src:
                s = 2 * (n_src - 1) - s
            m[i, s] += 1.0
    return m


def _vmem_limit_bytes():
    """Generation-aware scoped-VMEM limit (75% of physical, capped at 96 MiB)."""
    try:
        cap = int(pltpu.get_tpu_info().vmem_capacity_bytes)
    except Exception:
        cap = 64 << 20  # conservative (v7x-sized) fallback
    return int(max(16 << 20, min(cap * 3 // 4, 96 << 20)))


def _pick_batch(n_planes, h, w_eff, ho, wo_eff, limit_bytes, row_cap=512):
    """Effective planes per grid step, bounded by VMEM and the operator size."""
    budget = limit_bytes // 2                     # headroom for compiler temps
    per_plane = 4 * (2 * 2 * h * w_eff            # x, y blocks (double buffered)
                     + 2 * ho * wo_eff            # out block   (double buffered)
                     + 6 * h * w_eff              # in-kernel f32 temporaries
                     + 8 * ho * wo_eff)           # pooled quantities / tail
    b = max(1, budget // max(per_plane, 1))
    b = min(b, n_planes, max(1, row_cap // max(h, 1)))
    while b > 1 and 2 * 4 * (b * ho) * (b * h) + b * per_plane > budget:
        b -= 1                                    # keep kron(I_B, VR) in budget
    return int(b)


def ssim_pallas(x, y, ws=3):
    """SSIM loss map matching the PyTorch module's forward (NCHW layout)."""
    assert x.shape == y.shape and x.ndim == 4
    N, C, H, W = x.shape
    pad = (ws - 1) // 2
    assert pad < H and pad < W, "reflection pad must be smaller than the plane"
    Ho = H + 2 * pad - ws + 1
    Wo = W + 2 * pad - ws + 1
    NC = N * C
    dtype = x.dtype

    # --- lane packing: fold G planes into the lane axis when W < 128 -------- #
    G = 1
    if W < 128 and NC > 1:
        # keep >= 2 effective planes so the grid can still be split across TCs
        G = max(1, min(128 // W, pl.cdiv(NC, 2)))
    NCg = pl.cdiv(NC, G)

    x2 = x.reshape(NC, H, W)
    y2 = y.reshape(NC, H, W)
    if NCg * G != NC:
        pn = NCg * G - NC   # zero planes: SSIM_d = C1*C2 > 0, sliced off below
        x2 = jnp.pad(x2, ((0, pn), (0, 0), (0, 0)))
        y2 = jnp.pad(y2, ((0, pn), (0, 0), (0, 0)))
    if G > 1:
        x2 = x2.reshape(NCg, G, H, W).transpose(0, 2, 1, 3).reshape(NCg, H, G * W)
        y2 = y2.reshape(NCg, G, H, W).transpose(0, 2, 1, 3).reshape(NCg, H, G * W)
    else:
        x2 = x2.reshape(NCg, H, W)
        y2 = y2.reshape(NCg, H, W)
    We, Woe = G * W, G * Wo

    # --- row batching: B effective planes per grid step --------------------- #
    vmem_limit = _vmem_limit_bytes()
    # keep the sublane dims of the input/output blocks multiples of 8
    req = _lcm(_lcm(8, H) // H, _lcm(8, Ho) // Ho)
    B = _pick_batch(NCg, H, We, Ho, Woe, vmem_limit)
    B = max(req, (B // req) * req)
    n_steps = pl.cdiv(NCg, B)
    if n_steps == 1 and B > req:
        # v7x megacore: prefer >= 2 parallel grid steps
        B = req * pl.cdiv(pl.cdiv(NCg, 2), req)
        n_steps = pl.cdiv(NCg, B)
    if n_steps > 1 and n_steps % 2 == 1:
        n_steps += 1                     # even step count for the 2 TensorCores
    NCg_pad = n_steps * B
    if NCg_pad != NCg:
        x2 = jnp.pad(x2, ((0, NCg_pad - NCg), (0, 0), (0, 0)))
        y2 = jnp.pad(y2, ((0, NCg_pad - NCg), (0, 0), (0, 0)))

    # Flatten to 2-D row-stacked planes: the kernel only sees plain matrices.
    x_rows = x2.reshape(NCg_pad * H, We)
    y_rows = y2.reshape(NCg_pad * H, We)

    # --- reflect-pad + box-sum operators (tiny, built once) ----------------- #
    inv = np.float32(1.0 / (ws * ws))
    VR = _reflect_box_matrix(H, ws)                     # (Ho, H)
    WR = _reflect_box_matrix(W, ws).T * inv             # (W, Wo), AvgPool norm folded
    vrb = jnp.asarray(np.kron(np.eye(B, dtype=np.float32), VR))       # (B*Ho, B*H)
    if G > 1:
        wrn = jnp.asarray(np.kron(np.eye(G, dtype=np.float32), WR))   # (We, Woe)
    else:
        wrn = jnp.asarray(WR)

    # --- pallas_call --------------------------------------------------------- #
    bh, bho = B * H, B * Ho
    itemsize = jnp.dtype(dtype).itemsize
    cost = pl.CostEstimate(
        flops=int(n_steps * (3 * bh * We                 # elementwise products
                             + 10 * bh * We * Woe        # 5 horizontal matmuls
                             + 10 * bho * bh * Woe       # 5 vertical matmuls
                             + 30 * bho * Woe)),         # SSIM formula tail
        transcendentals=int(n_steps * bho * Woe),
        bytes_accessed=int(n_steps * (2 * bh * We + bho * Woe) * itemsize
                           + 4 * (vrb.size + wrn.size)),
    )

    out_rows = pl.pallas_call(
        _ssim_kernel,
        out_shape=jax.ShapeDtypeStruct((NCg_pad * Ho, Woe), dtype),
        grid_spec=pltpu.PrefetchScalarGridSpec(
            num_scalar_prefetch=0,
            grid=(n_steps,),
            in_specs=[
                pl.BlockSpec((bh, We), lambda i: (i, 0)),
                pl.BlockSpec((bh, We), lambda i: (i, 0)),
                pl.BlockSpec((bho, bh), lambda i: (0, 0)),   # constant operator
                pl.BlockSpec((We, Woe), lambda i: (0, 0)),   # constant operator
            ],
            out_specs=pl.BlockSpec((bho, Woe), lambda i: (i, 0)),
        ),
        compiler_params=pltpu.CompilerParams(
            dimension_semantics=("parallel",),
            vmem_limit_bytes=vmem_limit,
        ),
        cost_estimate=cost,
    )(x_rows, y_rows, vrb, wrn)

    # --- unpack lane groups back to (N, C, Ho, Wo) --------------------------- #
    out = out_rows.reshape(NCg_pad, Ho, G, Wo)
    if G > 1:
        out = out.transpose(0, 2, 1, 3)
    return out.reshape(NCg_pad * G, Ho, Wo)[:NC].reshape(N, C, Ho, Wo)


# --------------------------------------------------------------------------- #
# Pure-JAX reference (mirrors the PyTorch module exactly)
# --------------------------------------------------------------------------- #
def _ssim_reference(x, y, ws=3):
    pad = (ws - 1) // 2
    xp = jnp.pad(x, ((0, 0), (0, 0), (pad, pad), (pad, pad)), mode="reflect")
    yp = jnp.pad(y, ((0, 0), (0, 0), (pad, pad), (pad, pad)), mode="reflect")

    def pool(a):
        N, C, Hp, Wp = a.shape
        Ho, Wo = Hp - ws + 1, Wp - ws + 1
        acc = jnp.zeros((N, C, Ho, Wo), a.dtype)
        for i in range(ws):
            for j in range(ws):
                acc = acc + a[:, :, i:i + Ho, j:j + Wo]
        return acc / (ws * ws)

    mu_x = pool(xp)
    mu_y = pool(yp)
    sigma_x = pool(xp * xp) - mu_x ** 2
    sigma_y = pool(yp * yp) - mu_y ** 2
    sigma_xy = pool(xp * yp) - mu_x * mu_y
    n = (2 * mu_x * mu_y + C1) * (2 * sigma_xy + C2)
    d = (mu_x ** 2 + mu_y ** 2 + C1) * (sigma_x + sigma_y + C2)
    return jnp.clip((1 - n / d) / 2, 0.0, 1.0)


if __name__ == "__main__":
    key = jax.random.PRNGKey(0)
    kx, ky = jax.random.split(key)
    N, C, H, W = 2, 4, 16, 16
    ws = 3  # SSIM window size (module __init__ arg)
    x = jax.random.uniform(kx, (N, C, H, W), dtype=jnp.float32)
    y = jax.random.uniform(ky, (N, C, H, W), dtype=jnp.float32)

    out = ssim_pallas(x, y, ws=ws)
    out = jax.block_until_ready(out)

    ref = _ssim_reference(x, y, ws=ws)
    assert out.shape == ref.shape, (out.shape, ref.shape)
    # MXU accumulation order differs slightly from the sequential reference
    # sums; 5e-5 absolute on a [0,1] output is well inside f32 noise for this
    # formula (denominators ~1e-2).
    assert jnp.allclose(out, ref, atol=5e-5, rtol=5e-5), "mismatch vs reference"

    print("KERNEL_OK")
</pallas_src>

<mosaic_0001>
module attributes {stable_mosaic.version = 11 : i64} {
  func.func @_ssim_kernel(%arg0: i32, %arg1: memref<16x64xf32, #tpu.memory_space<vmem>>, %arg2: memref<16x64xf32, #tpu.memory_space<vmem>>, %arg3: memref<16x16xf32, #tpu.memory_space<vmem>>, %arg4: memref<64x64xf32, #tpu.memory_space<vmem>>, %arg5: memref<16x64xf32, #tpu.memory_space<vmem>>) attributes {dimension_semantics = [#tpu.dimension_semantics<parallel>], iteration_bounds = array<i64: 2>, scalar_prefetch = 0 : i64, scratch_operands = 0 : i64, tpu.core_type = #tpu.core_type<tc>, window_params = [{transform_indices = @transform_0, window_bounds = array<i64: 16, 64>}, {transform_indices = @transform_1, window_bounds = array<i64: 16, 64>}, {pipeline_mode = #tpu.pipeline_mode<synchronous>, transform_indices = @transform_2, window_bounds = array<i64: 16, 16>}, {pipeline_mode = #tpu.pipeline_mode<synchronous>, transform_indices = @transform_3, window_bounds = array<i64: 64, 64>}, {transform_indices = @transform_4, window_bounds = array<i64: 16, 64>}]} {
    %c0 = arith.constant 0 : index
    %c0_0 = arith.constant 0 : index
    %0 = vector.load %arg1[%c0, %c0_0] : memref<16x64xf32, #tpu.memory_space<vmem>>, vector<16x64xf32>
    %c0_1 = arith.constant 0 : index
    %c0_2 = arith.constant 0 : index
    %1 = vector.load %arg2[%c0_1, %c0_2] : memref<16x64xf32, #tpu.memory_space<vmem>>, vector<16x64xf32>
    %c0_3 = arith.constant 0 : index
    %c0_4 = arith.constant 0 : index
    %2 = vector.load %arg3[%c0_3, %c0_4] : memref<16x16xf32, #tpu.memory_space<vmem>>, vector<16x16xf32>
    %c0_5 = arith.constant 0 : index
    %c0_6 = arith.constant 0 : index
    %3 = vector.load %arg4[%c0_5, %c0_6] : memref<64x64xf32, #tpu.memory_space<vmem>>, vector<64x64xf32>
    %cst = arith.constant dense<0.000000e+00> : vector<16x64xf32>
    %4 = tpu.matmul %0, %3, %cst {dimension_numbers = #tpu.dot_dimension_numbers<[1], [0], [0], [1], [0, 0, 1, 1], [], []>, precision = #tpu.contract_precision<fp32>} : vector<16x64xf32>, vector<64x64xf32>, vector<16x64xf32> -> vector<16x64xf32>
    %cst_7 = arith.constant dense<0.000000e+00> : vector<16x64xf32>
    %5 = tpu.matmul %2, %4, %cst_7 {dimension_numbers = #tpu.dot_dimension_numbers<[1], [0], [0], [1], [0, 0, 1, 1], [], []>, precision = #tpu.contract_precision<fp32>} : vector<16x16xf32>, vector<16x64xf32>, vector<16x64xf32> -> vector<16x64xf32>
    %cst_8 = arith.constant dense<0.000000e+00> : vector<16x64xf32>
    %6 = tpu.matmul %1, %3, %cst_8 {dimension_numbers = #tpu.dot_dimension_numbers<[1], [0], [0], [1], [0, 0, 1, 1], [], []>, precision = #tpu.contract_precision<fp32>} : vector<16x64xf32>, vector<64x64xf32>, vector<16x64xf32> -> vector<16x64xf32>
    %cst_9 = arith.constant dense<0.000000e+00> : vector<16x64xf32>
    %7 = tpu.matmul %2, %6, %cst_9 {dimension_numbers = #tpu.dot_dimension_numbers<[1], [0], [0], [1], [0, 0, 1, 1], [], []>, precision = #tpu.contract_precision<fp32>} : vector<16x16xf32>, vector<16x64xf32>, vector<16x64xf32> -> vector<16x64xf32>
    %8 = arith.mulf %0, %0 : vector<16x64xf32>
    %cst_10 = arith.constant dense<0.000000e+00> : vector<16x64xf32>
    %9 = tpu.matmul %8, %3, %cst_10 {dimension_numbers = #tpu.dot_dimension_numbers<[1], [0], [0], [1], [0, 0, 1, 1], [], []>, precision = #tpu.contract_precision<fp32>} : vector<16x64xf32>, vector<64x64xf32>, vector<16x64xf32> -> vector<16x64xf32>
    %cst_11 = arith.constant dense<0.000000e+00> : vector<16x64xf32>
    %10 = tpu.matmul %2, %9, %cst_11 {dimension_numbers = #tpu.dot_dimension_numbers<[1], [0], [0], [1], [0, 0, 1, 1], [], []>, precision = #tpu.contract_precision<fp32>} : vector<16x16xf32>, vector<16x64xf32>, vector<16x64xf32> -> vector<16x64xf32>
    %11 = arith.mulf %5, %5 : vector<16x64xf32>
    %12 = arith.subf %10, %11 : vector<16x64xf32>
    %13 = arith.mulf %1, %1 : vector<16x64xf32>
    %cst_12 = arith.constant dense<0.000000e+00> : vector<16x64xf32>
    %14 = tpu.matmul %13, %3, %cst_12 {dimension_numbers = #tpu.dot_dimension_numbers<[1], [0], [0], [1], [0, 0, 1, 1], [], []>, precision = #tpu.contract_precision<fp32>} : vector<16x64xf32>, vector<64x64xf32>, vector<16x64xf32> -> vector<16x64xf32>
    %cst_13 = arith.constant dense<0.000000e+00> : vector<16x64xf32>
    %15 = tpu.matmul %2, %14, %cst_13 {dimension_numbers = #tpu.dot_dimension_numbers<[1], [0], [0], [1], [0, 0, 1, 1], [], []>, precision = #tpu.contract_precision<fp32>} : vector<16x16xf32>, vector<16x64xf32>, vector<16x64xf32> -> vector<16x64xf32>
    %16 = arith.mulf %7, %7 : vector<16x64xf32>
    %17 = arith.subf %15, %16 : vector<16x64xf32>
    %18 = arith.mulf %0, %1 : vector<16x64xf32>
    %cst_14 = arith.constant dense<0.000000e+00> : vector<16x64xf32>
    %19 = tpu.matmul %18, %3, %cst_14 {dimension_numbers = #tpu.dot_dimension_numbers<[1], [0], [0], [1], [0, 0, 1, 1], [], []>, precision = #tpu.contract_precision<fp32>} : vector<16x64xf32>, vector<64x64xf32>, vector<16x64xf32> -> vector<16x64xf32>
    %cst_15 = arith.constant dense<0.000000e+00> : vector<16x64xf32>
    %20 = tpu.matmul %2, %19, %cst_15 {dimension_numbers = #tpu.dot_dimension_numbers<[1], [0], [0], [1], [0, 0, 1, 1], [], []>, precision = #tpu.contract_precision<fp32>} : vector<16x16xf32>, vector<16x64xf32>, vector<16x64xf32> -> vector<16x64xf32>
    %21 = arith.mulf %5, %7 : vector<16x64xf32>
    %22 = arith.subf %20, %21 : vector<16x64xf32>
    %cst_16 = arith.constant 2.000000e+00 : f32
    %23 = vector.broadcast %cst_16 : f32 to vector<16x64xf32>
    %24 = arith.mulf %23, %5 : vector<16x64xf32>
    %25 = arith.mulf %24, %7 : vector<16x64xf32>
    %cst_17 = arith.constant 9.99999974E-5 : f32
    %26 = vector.broadcast %cst_17 : f32 to vector<16x64xf32>
    %27 = arith.addf %25, %26 : vector<16x64xf32>
    %cst_18 = arith.constant 2.000000e+00 : f32
    %28 = vector.broadcast %cst_18 : f32 to vector<16x64xf32>
    %29 = arith.mulf %28, %22 : vector<16x64xf32>
    %cst_19 = arith.constant 8.99999984E-4 : f32
    %30 = vector.broadcast %cst_19 : f32 to vector<16x64xf32>
    %31 = arith.addf %29, %30 : vector<16x64xf32>
    %32 = arith.mulf %27, %31 : vector<16x64xf32>
    %33 = arith.mulf %5, %5 : vector<16x64xf32>
    %34 = arith.mulf %7, %7 : vector<16x64xf32>
    %35 = arith.addf %33, %34 : vector<16x64xf32>
    %cst_20 = arith.constant 9.99999974E-5 : f32
    %36 = vector.broadcast %cst_20 : f32 to vector<16x64xf32>
    %37 = arith.addf %35, %36 : vector<16x64xf32>
    %38 = arith.addf %12, %17 : vector<16x64xf32>
    %cst_21 = arith.constant 8.99999984E-4 : f32
    %39 = vector.broadcast %cst_21 : f32 to vector<16x64xf32>
    %40 = arith.addf %38, %39 : vector<16x64xf32>
    %41 = arith.mulf %37, %40 : vector<16x64xf32>
    %42 = tpu.reciprocal %41 {approx = true} : vector<16x64xf32> -> vector<16x64xf32>
    %43 = arith.mulf %41, %42 : vector<16x64xf32>
    %cst_22 = arith.constant 2.000000e+00 : f32
    %44 = vector.broadcast %cst_22 : f32 to vector<16x64xf32>
    %45 = arith.subf %44, %43 : vector<16x64xf32>
    %46 = arith.mulf %42, %45 : vector<16x64xf32>
    %47 = arith.mulf %32, %46 : vector<16x64xf32>
    %cst_23 = arith.constant 1.000000e+00 : f32
    %48 = vector.broadcast %cst_23 : f32 to vector<16x64xf32>
    %49 = arith.subf %48, %47 : vector<16x64xf32>
    %cst_24 = arith.constant 5.000000e-01 : f32
    %50 = vector.broadcast %cst_24 : f32 to vector<16x64xf32>
    %51 = arith.mulf %49, %50 : vector<16x64xf32>
    %cst_25 = arith.constant 0.000000e+00 : f32
    %cst_26 = arith.constant 1.000000e+00 : f32
    %52 = vector.broadcast %cst_25 : f32 to vector<16x64xf32>
    %53 = arith.maximumf %52, %51 : vector<16x64xf32>
    %54 = vector.broadcast %cst_26 : f32 to vector<16x64xf32>
    %55 = arith.minimumf %54, %53 : vector<16x64xf32>
    %c0_27 = arith.constant 0 : index
    %c0_28 = arith.constant 0 : index
    %56 = vector.load %arg5[%c0_27, %c0_28] : memref<16x64xf32, #tpu.memory_space<vmem>>, vector<16x64xf32>
    tpu.vector_store %arg5[%c0_27, %c0_28], %55 {strides = array<i32>} : memref<16x64xf32, #tpu.memory_space<vmem>>, vector<16x64xf32>,
    return
  }
  func.func @transform_0(%arg0: i32) -> (i32, i32) {
    %c0_i32 = arith.constant 0 : i32
    %c0_i32_0 = arith.constant 0 : i32
    return %arg0, %c0_i32 : i32, i32
  }
  func.func @transform_1(%arg0: i32) -> (i32, i32) {
    %c0_i32 = arith.constant 0 : i32
    %c0_i32_0 = arith.constant 0 : i32
    return %arg0, %c0_i32 : i32, i32
  }
  func.func @transform_2(%arg0: i32) -> (i32, i32) {
    %c0_i32 = arith.constant 0 : i32
    %c0_i32_0 = arith.constant 0 : i32
    %c0_i32_1 = arith.constant 0 : i32
    return %c0_i32, %c0_i32_0 : i32, i32
  }
  func.func @transform_3(%arg0: i32) -> (i32, i32) {
    %c0_i32 = arith.constant 0 : i32
    %c0_i32_0 = arith.constant 0 : i32
    %c0_i32_1 = arith.constant 0 : i32
    return %c0_i32, %c0_i32_0 : i32, i32
  }
  func.func @transform_4(%arg0: i32) -> (i32, i32) {
    %c0_i32 = arith.constant 0 : i32
    %c0_i32_0 = arith.constant 0 : i32
    return %arg0, %c0_i32 : i32, i32
  }
}

</mosaic_0001>

<bundles_post_ra>
// kernel: tpu_custom_call.1
= control target key start
LH: loop header
LB: loop body
LE: loop exit
PB: predicated region body
PF: predicated region fallthrough
CT: control target
= control target key end

     0   :  { %s8641_s0 = inlined_call_operand.hbm [shape: f32[32,64], index: 0, kind: input, shape index: {}]   ;;  %s8642_s1 = inlined_call_operand.hbm [shape: f32[32,64], index: 1, kind: input, shape index: {}]   ;;  %s8643_s2 = inlined_call_operand.hbm [shape: f32[16,16], index: 2, kind: input, shape index: {}]   ;;  %s8644_s3 = inlined_call_operand.hbm [shape: f32[64,64], index: 3, kind: input, shape index: {}]   ;;  %s8645_s4 = inlined_call_operand.hbm [shape: f32[32,64], index: 4, kind: output, shape index: {}]  }
   0x1   :  { %8671 = sst [smem:[#allocation29_spill]] %s8641_s0 }
   0x2   :  { %9 = vsyncpa [#allocation3], 0 }
   0x3   :  { %11 = vsyncpa [#allocation3 + $0x1], 0 }
   0x4   :  { %12 = vsyncpa [#allocation6], 0 }
   0x5   :  { %14 = vsyncpa [#allocation6 + $0x1], 0 }
   0x6   :  { %15 = vsyncpa [#allocation9], 0 }
   0x7   :  { %16 = vsyncpa [#allocation4], 0 }
   0x8   :  { %18 = vsyncpa [#allocation4 + $0x1], 0  ;;  %s7468_s15 = smov 0   ;;  %s7470_s16 = smov 0  }
   0x9   :  { %s7472_s17 = smov 0   ;;  %s7474_s18 = smov 0  }
   0xa LB: > { %s7489_s19 = sadd.s32 4294967295, %s7432_s18   ;;  %s5939_s20 = sadd.s32 4294967294, %s7432_s18   ;;  %s7432_s18 = sphi %s7474_s18, %s8736_s18   ;;  %s7428_s17 = sphi %s7472_s17, %s8735_s17   ;;  %s7424_s16 = sphi %s7470_s16, %s8734_s16   ;;  %s7420_s15 = sphi %s7468_s15, %s8733_s15  }
   0xb   : > { %p44_p0 = scmp.ne.s32.totalorder %s7424_s16, %s7420_s15  ;;  %p8650_p1 = scmp.eq.s32.totalorder %s7489_s19, 0 }
   0xc   : > { %p136_p2 = scmp.eq.s32.totalorder %s7489_s19, 1  ;;  %p142_p3 = scmp.eq.s32.totalorder %s5939_s20, 1 }
   0xd   : > { %p7498_p4 = por %p8650_p1, %p44_p0  ;;  %p5940_p5 = scmp.ge.s32.totalorder %s7432_s18, 1 }
   0xe   : > { %p7503_p6 = por %p142_p3, %p44_p0  ;;  %p149_p7 = scmp.lt.s32.totalorder %s7432_s18, 3 }
   0xf   : > { %s8672_s21 = scalar_select %p7498_p4, 1, 0 }
  0x10   : > { %s8673_s22 = scalar_select %p7503_p6, 1, 0 }
  0x11   : > { %p7508_p8 = pnand %p5940_p5, %p149_p7  ;;  %s7434_s24 = smov [#allocation7]  }
  0x12   : > { %s161_s25 = sshll.u32 %s7434_s24, 4  ;;  %s7435_s27 = smov [#allocation8]   ;;  %s162_s25 = int_to_ptr.vmem [resolvable:$true] %s161_s25 }
  0x13   : > { %p7178_p9 = pneg %p7508_p8  ;;  %s174_s28 = sshll.u32 %s7435_s27, 4  ;;  %s175_s28 = int_to_ptr.vmem [resolvable:$true] %s174_s28 }
  0x14   : > { %s7259_s29 = scalar_lea.vmem %s162_s25, 256  ;;  %p7267_p5 = scmp.lt.s32.totalorder %s162_s25, %s162_s25 }
  0x15   : > { %p7517_p11 = pnand %p7178_p9, %p8650_p1  ;;  %p7260_p13 = scmp.ne.s32.totalorder %s162_s25, %s7259_s29 }
  0x16   : > { %p7268_p7 = scmp.lt.s32.totalorder %s7259_s29, %s7259_s29 }
  0x17   : > { %p7250_p12 = pneg %p7517_p11 }
  0x18   : > { %p7269_p10 = por %p7268_p7, %p7267_p5 }
  0x19   : > { %p7262_p0 = pnand %p7260_p13, %p7250_p12 }
  0x1b   : > { %p7263_p3 = pneg %p7262_p0 }
  0x1d   : > { %p7270_p9 = pnand %p7269_p10, %p7263_p3 }
  0x1f   : > { %7273 = shalt.err (!%p7270_p9)
}
  0x20   : > { %s8646_s30 = smov 128   ;;  %s8648_s5 = smov 8  }
  0x21   : > { %7181 = dma.hbm_to_vmem [thread:$0]  (!%p7517_p11), %s8643_s2, 256, %s162_s25, [#allocation6], %s8646_s30, %s8646_s30, %s8648_s5  }
  0x22   : > { %s7285_s8 = scalar_lea.vmem %s175_s28, 1024  ;;  %p7293_p10 = scmp.lt.s32.totalorder %s175_s28, %s175_s28 }
  0x23   : > { %p7286_p13 = scmp.ne.s32.totalorder %s175_s28, %s7285_s8  ;;  %p7294_p3 = scmp.lt.s32.totalorder %s7285_s8, %s7285_s8 }
  0x25   : > { %p7288_p0 = pnand %p7286_p13, %p7250_p12  ;;  %p7295_p7 = por %p7294_p3, %p7293_p10 }
  0x27   : > { %p7289_p5 = pneg %p7288_p0 }
  0x29   : > { %p7296_p9 = pnand %p7295_p7, %p7289_p5 }
  0x2b   : > { %7299 = shalt.err (!%p7296_p9)
}
  0x2c   : > { %7184 = dma.hbm_to_vmem [thread:$0]  (!%p7517_p11), %s8644_s3, 1024, %s175_s28, [#allocation9], %s8646_s30, %s8646_s30, %s8648_s5  }
  0x2d   : > { %s7546_s11 = sadd.s32 1, %s7432_s18   ;;  %s31_s12 = sadd.s32 1, %s7428_s17 }
  0x2e   : > { %s28_s13 = ssub.s32 %s7432_s18, %s7546_s11  ;;  %p38_p12 = scmp.ne.s32.totalorder %s7428_s17, %s7424_s16 }
  0x2f   : > { %p29_p13 = scmp.eq.s32.totalorder %s28_s13, 0  ;;  %p39_p0 = scmp.eq.s32.totalorder %s7432_s18, 0 }
  0x30   : > { %p7556_p5 = por %p136_p2, %p38_p12  ;;  %p7198_p10 = scmp.lt.s32.totalorder %s7432_s18, 2 }
  0x31   : > { %s7562_s20 = scalar_select %p29_p13, %s7428_s17, %s31_s12  }
  0x32   : > { %s8676_s14 = scalar_select %p7556_p5, 1, 0 }
  0x33   : > { %p40_p3 = por %p39_p0, %p38_p12  ;;  %s188_s24 = sand.u32 1, %s7428_s17  }
  0x34   : > { %s5944_s25 = sshll.u32 %s188_s24, 4  ;;  %s5961_s26 = sshll.u32 %s7432_s18, 8 }
  0x35   : > { %s8677_s0 = sld [smem:[#allocation29_spill]]  ;;  %s192_s6 = scalar_lea.vmem [#allocation2], %s5944_s25 }
  0x36   : > { %s199_s7 = sshll.u32 %s192_s6, 4  ;;  %p7573_p2 = pnand %p7198_p10, %p40_p3  ;;  %s7571_s7 = int_to_ptr.vmem [resolvable:$true] %s199_s7 }
  0x37   : > { %s7580_s12 = scalar_lea.hbm %s8642_s1, %s5961_s26  ;;  %s213_s13 = scalar_lea.vmem [#allocation5], %s5944_s25 }
  0x38   : > { %s7582_s27 = sshll.u32 %s213_s13, 4  ;;  %s7584_s28 = scalar_lea.sflag [#allocation3], %s188_s24  ;;  %s7615_s27 = int_to_ptr.vmem [resolvable:$true] %s7582_s27 }
  0x39   : > { %p7302_p7 = pneg %p7573_p2 }
  0x3b   : > { %s7569_s29 = scalar_lea.hbm %s8677_s0, %s5961_s26  ;;  %s7305_s9 = scalar_lea.hbm %s8677_s0, 512 }
  0x3c   : > { %s7300_s30 = scalar_lea.hbm %s7569_s29, 256  ;;  %p7306_p13 = scmp.lt.s32.totalorder %s7569_s29, %s8677_s0 }
  0x3d   : > { %p7301_p11 = scmp.ne.s32.totalorder %s7569_s29, %s7300_s30  ;;  %p7307_p0 = scmp.lt.s32.totalorder %s7305_s9, %s7300_s30 }
  0x3f   : > { %p7303_p9 = pnand %p7302_p7, %p7301_p11  ;;  %p7308_p10 = por %p7307_p0, %p7306_p13 }
  0x41   : > { %p7304_p12 = pneg %p7303_p9 }
  0x43   : > { %p7309_p3 = pnand %p7308_p10, %p7304_p12 }
  0x45   : > { %7312 = shalt.err (!%p7309_p3)
}
  0x46   : > { %s7313_s24 = scalar_lea.vmem %s7571_s7, 256  ;;  %s7438_s5 = smov [#allocation2]  }
  0x47   : > { %p7314_p1 = scmp.ne.s32.totalorder %s7571_s7, %s7313_s24  ;;  %s7318_s25 = sshll.u32 %s7438_s5, 4  ;;  %s7319_s25 = int_to_ptr.vmem [resolvable:$false] %s7318_s25 }
  0x48   : > { %s7320_s13 = scalar_lea.vmem %s7319_s25, 512  ;;  %p7321_p6 = scmp.lt.s32.totalorder %s7571_s7, %s7319_s25 }
  0x49   : > { %p7316_p11 = pnand %p7314_p1, %p7302_p7  ;;  %p7322_p5 = scmp.lt.s32.totalorder %s7320_s13, %s7313_s24 }
  0x4b   : > { %p7317_p9 = pneg %p7316_p11  ;;  %p7323_p4 = por %p7322_p5, %p7321_p6 }
  0x4d   : > { %p7324_p13 = pnand %p7323_p4, %p7317_p9 }
  0x4f   : > { %7327 = shalt.err (!%p7324_p13)
}
  0x50   : > { %s8679_s30 = smov 8   ;;  %s8680_s6 = smov 128  }
  0x51   : > { %7188 = dma.hbm_to_vmem [thread:$0]  (!%p7573_p2), %s7569_s29, 256, %s7571_s7, %s7584_s28, %s8680_s6, %s8680_s6, %s8679_s30  }
  0x52   : > { %s209_s9 = sand.u32 1, %s7432_s18   ;;  %s7328_s26 = scalar_lea.hbm %s7580_s12, 256 }
  0x53   : > { %s210_s10 = scalar_lea.sflag [#allocation6], %s209_s9  ;;  %p7329_p1 = scmp.ne.s32.totalorder %s7580_s12, %s7328_s26 }
  0x54   : > { %s7333_s25 = scalar_lea.hbm %s8642_s1, 512  ;;  %p7334_p5 = scmp.lt.s32.totalorder %s7580_s12, %s8642_s1 }
  0x55   : > { %p7331_p4 = pnand %p7329_p1, %p7302_p7  ;;  %p7335_p12 = scmp.lt.s32.totalorder %s7333_s25, %s7328_s26 }
  0x57   : > { %p7332_p6 = pneg %p7331_p4  ;;  %p7336_p0 = por %p7335_p12, %p7334_p5 }
  0x59   : > { %p7337_p10 = pnand %p7336_p0, %p7332_p6 }
  0x5b   : > { %7340 = shalt.err (!%p7337_p10)
}
  0x5c   : > { %s7341_s29 = scalar_lea.vmem %s7615_s27, 256  ;;  %s7439_s7 = smov [#allocation5]  }
  0x5d   : > { %p7342_p3 = scmp.ne.s32.totalorder %s7615_s27, %s7341_s29  ;;  %s7346_s28 = sshll.u32 %s7439_s7, 4  ;;  %s7347_s28 = int_to_ptr.vmem [resolvable:$false] %s7346_s28 }
  0x5e   : > { %s7348_s9 = scalar_lea.vmem %s7347_s28, 512  ;;  %p7349_p13 = scmp.lt.s32.totalorder %s7615_s27, %s7347_s28 }
  0x5f   : > { %p7344_p11 = pnand %p7342_p3, %p7302_p7  ;;  %p7350_p1 = scmp.lt.s32.totalorder %s7348_s9, %s7341_s29 }
  0x61   : > { %p7345_p9 = pneg %p7344_p11  ;;  %p7351_p4 = por %p7350_p1, %p7349_p13 }
  0x63   : > { %p7352_p5 = pnand %p7351_p4, %p7345_p9 }
  0x65   : > { %7355 = shalt.err (!%p7352_p5)
}
  0x66   : > { %7191 = dma.hbm_to_vmem [thread:$0]  (!%p7573_p2), %s7580_s12, 256, %s7615_s27, %s210_s10, %s8680_s6, %s8680_s6, %s8679_s30  }
  0x67   : > { %232 = sbr.rel (%p7508_p8) target bundleno = 1728 (0x6c0), region = 36 }
  0x6c   : > { %s7646_s0 = sand.u32 1, %s7424_s16   ;;  %p8681_p7 = scmp.ne.s32.totalorder %s8672_s21, 0 }
  0x6d   : > { %s7649_s26 = sshll.u32 %s7646_s0, 4  ;;  %s235_s24 = scalar_lea.sflag [#allocation3], %s7646_s0 }
  0x6e   : > { %s7653_s8 = scalar_lea.vmem [#allocation2], %s7649_s26 }
  0x6f   : > { %7399 = dma.done.wait (%p8681_p7), %s235_s24, 256  }
  0x70   : > { %7401 = vsyncadd (%p8681_p7), %s235_s24, 4294967040  ;;  %s243_s23 = sand.u32 1, %s7489_s19   ;;  %s7661_s27 = scalar_lea.vmem [#allocation5], %s7649_s26 }
  0x71   : > { %s244_s12 = scalar_lea.sflag [#allocation6], %s243_s23 }
  0x72   : > { %7403 = dma.done.wait (%p8681_p7), %s244_s12, 256  }
  0x73   : > { %7405 = vsyncadd (%p8681_p7), %s244_s12, 4294967040  ;;  %p8682_p8 = scmp.eq.s32.totalorder %s7489_s19, 0 }
  0x75   : > { %7407 = dma.done.wait (%p8682_p8), [#allocation6], 256   ;;  %p8683_p2 = pmov %p8682_p8 }
  0x77   : > { %7409 = vsyncadd (%p8683_p2), [#allocation6], 4294967040  ;;  %p8684_p6 = pmov %p8683_p2 }
  0x78   : > { %p8685_p12 = pmov %p8683_p2 }
  0x79   : > { %7411 = dma.done.wait (%p8684_p6), [#allocation9], 1024  }
  0x7a   : > { %7413 = vsyncadd (%p8685_p12), [#allocation9], 4294966272  ;;  %v301_v0 = vld [vmem:[#allocation8 + $0x38] sm:$0xff]  ;;  %v300_v1 = vld [vmem:[#allocation8 + $0x30] sm:$0xff]  ;;  %vm302_vm0 = vcmask 523264   ;;  %vm889_vm1 = vcmask 130048  }
  0x7b   : > { %v299_v2 = vld [vmem:[#allocation8 + $0x28] sm:$0xff]  ;;  %v7675_v3 = vand.u32 4294901760, %v301_v0  ;;  %v7677_v4 = vand.u32 4294901760, %v300_v1  ;;  %v298_v6 = vld [vmem:[#allocation8 + $0x20] sm:$0xff]  ;;  %v297_v7 = vld [vmem:[#allocation8 + $0x18] sm:$0xff]  ;;  %s5963_s21 = sshll.u32 %s7489_s19, 8 }
  0x7c   : > { %v7679_v5 = vand.u32 4294901760, %v299_v2  ;;  %v296_v8 = vld [vmem:[#allocation8 + $0x10] sm:$0xff]  ;;  %v7681_v9 = vand.u32 4294901760, %v298_v6  ;;  %v7683_v10 = vand.u32 4294901760, %v297_v7  ;;  %v295_v14 = vld [vmem:[#allocation8 + $0x8] sm:$0xff]  ;;  %v294_v23 = vld [vmem:[#allocation8] sm:$0xff]  ;;  %s8594_s25 = scalar_lea.hbm %s8645_s4, %s5963_s21 }
  0x7d   : > { %v7686_v11 = vld [vmem:[%s7653_s8] sm:$0xff]  ;;  %6384 = vmatprep.subr.mxu0 %v7675_v3  ;;  %v7690_v12 = vsub.f32 %v301_v0, %v7675_v3  ;;  %v7693_v13 = vsub.f32 %v300_v1, %v7677_v4  ;;  %v7699_v16 = vld [vmem:[%s7653_s8 + $0x8] sm:$0xff]  ;;  %v7702_v17 = vand.u32 4294901760, %v296_v8  ;;  %v7722_v25 = vand.u32 4294901760, %v295_v14  ;;  %s284_s30 = scalar_lea.vmem [#allocation10], %s7649_s26  ;;  %s5811_s19 = scalar_lea.sflag [#allocation4], %s7646_s0 }
  0x7e   : > { %v7696_v15 = vsub.f32 %v299_v2, %v7679_v5  ;;  %6385 = vmatpush3.msra.mxu0 %v7675_v3  ;;  %v7705_v18 = vsub.f32 %v298_v6, %v7681_v9  ;;  %v304_v19 = vsel %vm302_vm0, %v7686_v11, 0  ;;  %v7728_v27 = vsub.f32 %v297_v7, %v7683_v10  ;;  %v292_v62 = vld [vmem:[#allocation7] sm:$0xff]  ;;  %s5824_s6 = sshll.u32 %s284_s30, 4  ;;  %p8730_p10 = scmp.ne.s32.totalorder %s8676_s14, 0  ;;  %s8596_s6 = int_to_ptr.vmem [resolvable:$true] %s5824_s6 }
  0x7f   : > { %6386 = vmatprep.subr.mxu0 %v7677_v4  ;;  %v7711_v20 = vand.u32 4294901760, %v7690_v12  ;;  %v7714_v21 = vand.u32 4294901760, %v7693_v13  ;;  %v7719_v24 = vand.u32 4294901760, %v304_v19  ;;  %v307_v28 = vsel %vm302_vm0, %v7699_v16, 0  ;;  %s7356_s13 = scalar_lea.vmem %s8596_s6, 256  ;;  %s7440_s29 = smov [#allocation10]  }
  0x80   : > { %v7717_v22 = vand.u32 4294901760, %v7696_v15  ;;  %6387 = vmatpush3.msra.mxu0 %v7677_v4  ;;  %v7725_v26 = vand.u32 4294901760, %v7705_v18  ;;  %v7743_v33 = vand.u32 4294901760, %v294_v23  ;;  %v7746_v34 = vand.u32 4294901760, %v7728_v27  ;;  %p7357_p0 = scmp.ne.s32.totalorder %s8596_s6, %s7356_s13  ;;  %s7360_s7 = sshll.u32 %s7440_s29, 4  ;;  %s7361_s7 = int_to_ptr.vmem [resolvable:$false] %s7360_s7 }
  0x81   : > { %6388 = vmatprep.subr.mxu0 %v7679_v5  ;;  %v422_v29 = vsub.f32 %v7690_v12, %v7711_v20  ;;  %v429_v30 = vsub.f32 %v7693_v13, %v7714_v21  ;;  %v7740_v32 = vsub.f32 %v304_v19, %v7719_v24  ;;  %v7748_v35 = vand.u32 4294901760, %v307_v28  ;;  %6419 = vmatprep.mubr.f32.mxu1 %v7719_v24  ;;  %s7362_s28 = scalar_lea.vmem %s7361_s7, 512  ;;  %p7363_p9 = scmp.lt.s32.totalorder %s8596_s6, %s7361_s7 }
  0x82   : > { %v436_v31 = vsub.f32 %v7696_v15, %v7717_v22  ;;  %6389 = vmatpush3.msra.mxu0 %v7679_v5  ;;  %v443_v38 = vsub.f32 %v7705_v18, %v7725_v26  ;;  %v450_v40 = vsub.f32 %v7728_v27, %v7746_v34  ;;  %v7773_v44 = vsub.f32 %v296_v8, %v7702_v17  ;;  %p7358_p3 = pnand %p7357_p0, %p8730_p10  ;;  %p7364_p13 = scmp.lt.s32.totalorder %s7362_s28, %s7356_s13 }
  0x83   : > { %6390 = vmatprep.subr.mxu0 %v7681_v9  ;;  %v7752_v36 = vand.u32 4294901760, %v422_v29  ;;  %v7754_v37 = vand.u32 4294901760, %v429_v30  ;;  %v384_v39 = vand.u32 4294901760, %v7740_v32  ;;  %v7763_v41 = vsub.f32 %v307_v28, %v7748_v35 }
  0x84   : > { %6391 = vmatpush3.msra.mxu0 %v7681_v9  ;;  %v7767_v42 = vand.u32 4294901760, %v436_v31  ;;  %v7776_v45 = vsub.f32 %v295_v14, %v7722_v25  ;;  %v7782_v47 = vsub.f32 %v294_v23, %v7743_v33  ;;  %v7786_v48 = vand.u32 4294901760, %v443_v38  ;;  %v293_v14 = vld [vmem:[#allocation7 + $0x8] sm:$0xff]  ;;  %p7359_p11 = pneg %p7358_p3  ;;  %p7365_p1 = por %p7364_p13, %p7363_p9 }
  0x85   : > { %6392 = vmatprep.subr.mxu0 %v7683_v10  ;;  %6403 = vmatprep.subr.mxu1 %v7752_v36  ;;  %v385_v43 = vsub.f32 %v7740_v32, %v384_v39  ;;  %v394_v46 = vand.u32 4294901760, %v7763_v41  ;;  %v7789_v49 = vand.u32 4294901760, %v7773_v44  ;;  %v7804_v54 = vand.u32 4294901760, %v450_v40 }
  0x86   : > { %6393 = vmatpush3.msra.mxu0 %v7683_v10  ;;  %6404 = vmatpush3.msra.mxu1 %v7752_v36  ;;  %v7792_v50 = vand.u32 4294901760, %v7776_v45  ;;  %v7800_v52 = vand.u32 4294901760, %v7782_v47  ;;  %v891_v63 = vsel %vm889_vm1, %v292_v62, 0  ;;  %p7366_p4 = pnand %p7365_p1, %p7359_p11 }
  0x87   : > { %6394 = vmatprep.subr.mxu0 %v7702_v17  ;;  %6405 = vmatprep.subr.mxu1 %v7754_v37  ;;  %v395_v51 = vsub.f32 %v7763_v41, %v394_v46  ;;  %v386_v53 = vand.u32 4294901760, %v385_v43  ;;  %v457_v55 = vsub.f32 %v7773_v44, %v7789_v49  ;;  %v7907_v0 = vand.u32 4294901760, %v891_v63 }
  0x88   : > { %8686 = vst [vmem:[#allocation16_spill] sm:$0xff] %v7792_v50  ;;  %6395 = vmatpush3.msra.mxu0 %v7702_v17  ;;  %6406 = vmatpush3.msra.mxu1 %v7754_v37  ;;  %8687 = vst [vmem:[#allocation17_spill] sm:$0xff] %v7800_v52  ;;  %v464_v57 = vsub.f32 %v7776_v45, %v7792_v50  ;;  %v471_v59 = vsub.f32 %v7782_v47, %v7800_v52 }
  0x89   : > { %6396 = vmatprep.subr.mxu0 %v7722_v25  ;;  %6407 = vmatprep.subr.mxu1 %v7767_v42  ;;  %v396_v56 = vand.u32 4294901760, %v395_v51  ;;  %v7816_v58 = vand.u32 4294901760, %v457_v55  ;;  %v7910_v1 = vsub.f32 %v891_v63, %v7907_v0 }
  0x8a   : > { %6397 = vmatpush3.msra.mxu0 %v7722_v25  ;;  %6408 = vmatpush3.msra.mxu1 %v7767_v42  ;;  %v7822_v60 = vand.u32 4294901760, %v464_v57  ;;  %v7828_v61 = vand.u32 4294901760, %v471_v59 }
  0x8b   : > { %6398 = vmatprep.subr.mxu0 %v7743_v33  ;;  %6409 = vmatprep.subr.mxu1 %v7786_v48  ;;  %v7914_v2 = vand.u32 4294901760, %v7910_v1 }
  0x8c   : > { %6399 = vmatpush3.msra.mxu0 %v7743_v33  ;;  %6410 = vmatpush3.msra.mxu1 %v7786_v48 }
  0x8d   : > { %6400 = vmatprep.mubr.f32.mxu0 %v386_v53  ;;  %6411 = vmatprep.subr.mxu1 %v7804_v54  ;;  %v966_v6 = vsub.f32 %v7910_v1, %v7914_v2 }
  0x8e   : > { %6422 = vmatprep.subr.mxu0 %v7690_v12  ;;  %6401 = vmatmul.mubr.f32.vlgmr.msra.gmra.mxu0 %v396_v56 }
  0x8f   : > { %6412 = vmatpush3.msra.mxu1 %v7804_v54  ;;  %6423 = vmatpush3.msra.mxu0 %v7690_v12  ;;  %v7918_v7 = vand.u32 4294901760, %v966_v6 }
  0x90   : > { %6413 = vmatprep.subr.mxu1 %v7816_v58  ;;  %6424 = vmatprep.subr.mxu0 %v7693_v13 }
  0x91   : > { %6414 = vmatpush3.msra.mxu1 %v7816_v58  ;;  %6425 = vmatpush3.msra.mxu0 %v7693_v13  ;;  %8688 = vst [vmem:[#allocation18_spill] sm:$0xff] %v7918_v7 }
  0x92   : > { %6415 = vmatprep.subr.mxu1 %v7822_v60  ;;  %6426 = vmatprep.subr.mxu0 %v7696_v15 }
  0x93   : > { %6416 = vmatpush3.msra.mxu1 %v7822_v60  ;;  %6427 = vmatpush3.msra.mxu0 %v7696_v15 }
  0x94   : > { %6417 = vmatprep.subr.mxu1 %v7828_v61  ;;  %6428 = vmatprep.subr.mxu0 %v7705_v18 }
  0x95   : > { %6418 = vmatpush3.msra.mxu1 %v7828_v61  ;;  %6429 = vmatpush3.msra.mxu0 %v7705_v18 }
  0x96   : > { %6420 = vmatmul.mubr.f32.vlgmr.msra.gmra.mxu1 %v7748_v35  ;;  %6430 = vmatprep.subr.mxu0 %v7728_v27 }
  0x97   : > { %6441 = vmatprep.subr.mxu1 %v7675_v3  ;;  %6431 = vmatpush3.msra.mxu0 %v7728_v27 }
  0x98   : > { %6442 = vmatpush3.msra.mxu1 %v7675_v3  ;;  %6432 = vmatprep.subr.mxu0 %v7773_v44 }
  0x99   : > { %6443 = vmatprep.subr.mxu1 %v7677_v4  ;;  %6433 = vmatpush3.msra.mxu0 %v7773_v44 }
  0x9a   : > { %6444 = vmatpush3.msra.mxu1 %v7677_v4  ;;  %6434 = vmatprep.subr.mxu0 %v7776_v45 }
  0x9b   : > { %6445 = vmatprep.subr.mxu1 %v7679_v5  ;;  %6435 = vmatpush3.msra.mxu0 %v7776_v45 }
  0x9c   : > { %6446 = vmatpush3.msra.mxu1 %v7679_v5  ;;  %6436 = vmatprep.subr.mxu0 %v7782_v47 }
  0x9d   : > { %6447 = vmatprep.subr.mxu1 %v7681_v9  ;;  %6437 = vmatpush3.msra.mxu0 %v7782_v47 }
  0x9e   : > { %6438 = vmatprep.mubr.f32.mxu0 %v7740_v32  ;;  %6448 = vmatpush3.msra.mxu1 %v7681_v9 }
  0x9f   : > { %6439 = vmatmul.mubr.f32.vlgmr.msra.gmra.mxu0 %v7763_v41  ;;  %6449 = vmatprep.subr.mxu1 %v7683_v10 }
  0xa0   : > { %6460 = vmatprep.subr.mxu0 %v7711_v20  ;;  %6450 = vmatpush3.msra.mxu1 %v7683_v10 }
  0xa1   : > { %6461 = vmatpush3.msra.mxu0 %v7711_v20  ;;  %6451 = vmatprep.subr.mxu1 %v7702_v17 }
  0xa2   : > { %6462 = vmatprep.subr.mxu0 %v7714_v21  ;;  %6452 = vmatpush3.msra.mxu1 %v7702_v17 }
  0xa3   : > { %6463 = vmatpush3.msra.mxu0 %v7714_v21  ;;  %6453 = vmatprep.subr.mxu1 %v7722_v25 }
  0xa4   : > { %6464 = vmatprep.subr.mxu0 %v7717_v22  ;;  %6454 = vmatpush3.msra.mxu1 %v7722_v25 }
  0xa5   : > { %6465 = vmatpush3.msra.mxu0 %v7717_v22  ;;  %6455 = vmatprep.subr.mxu1 %v7743_v33 }
  0xa6   : > { %6466 = vmatprep.subr.mxu0 %v7725_v26  ;;  %6456 = vmatpush3.msra.mxu1 %v7743_v33 }
  0xa7   : > { %6457 = vmatprep.mubr.f32.mxu1 %v384_v39  ;;  %6467 = vmatpush3.msra.mxu0 %v7725_v26 }
  0xa8   : > { %6458 = vmatmul.mubr.f32.vlgmr.msra.gmra.mxu1 %v394_v46  ;;  %6468 = vmatprep.subr.mxu0 %v7746_v34 }
  0xa9   : > { %6479 = vmatprep.subr.mxu1 %v7675_v3  ;;  %6469 = vmatpush3.msra.mxu0 %v7746_v34 }
  0xaa   : > { %6480 = vmatpush3.msra.mxu1 %v7675_v3  ;;  %6470 = vmatprep.subr.mxu0 %v7789_v49 }
  0xab   : > { %6481 = vmatprep.subr.mxu1 %v7677_v4  ;;  %6471 = vmatpush3.msra.mxu0 %v7789_v49 }
  0xac   : > { %6482 = vmatpush3.msra.mxu1 %v7677_v4  ;;  %6472 = vmatprep.subr.mxu0 %v7792_v50 }
  0xad   : > { %6483 = vmatprep.subr.mxu1 %v7679_v5  ;;  %6473 = vmatpush3.msra.mxu0 %v7792_v50 }
  0xae   : > { %6484 = vmatpush3.msra.mxu1 %v7679_v5  ;;  %6474 = vmatprep.subr.mxu0 %v7800_v52 }
  0xaf   : > { %6485 = vmatprep.subr.mxu1 %v7681_v9  ;;  %6475 = vmatpush3.msra.mxu0 %v7800_v52 }
  0xb0   : > { %6476 = vmatprep.mubr.f32.mxu0 %v7719_v24  ;;  %6486 = vmatpush3.msra.mxu1 %v7681_v9 }
  0xb1   : > { %6477 = vmatmul.mubr.f32.vlgmr.msra.gmra.mxu0 %v7748_v35  ;;  %6487 = vmatprep.subr.mxu1 %v7683_v10 }
  0xb2   : > { %6488 = vmatpush3.msra.mxu1 %v7683_v10  ;;  %6495 = vmatprep.mubr.f32.mxu1 %v7719_v24  ;;  %v894_v24 = vsel %vm889_vm1, %v293_v14, 0 }
  0xb3   : > { %6489 = vmatprep.subr.mxu1 %v7702_v17  ;;  %6502 = vmatprep.mubr.f32.mxu0 %v7918_v7  ;;  %v7921_v29 = vand.u32 4294901760, %v894_v24 }
  0xb4   : > { %6490 = vmatpush3.msra.mxu1 %v7702_v17 }
  0xb5   : > { %6491 = vmatprep.subr.mxu1 %v7722_v25  ;;  %v7924_v38 = vsub.f32 %v894_v24, %v7921_v29 }
  0xb6   : > { %6492 = vmatpush3.msra.mxu1 %v7722_v25 }
  0xb7   : > { %6493 = vmatprep.subr.mxu1 %v7743_v33  ;;  %v7927_v53 = vand.u32 4294901760, %v7924_v38 }
  0xb8   : > { %6494 = vmatpush3.msra.mxu1 %v7743_v33 }
  0xb9   : > { %6496 = vmatmul.mubr.f32.vlgmr.msra.gmra.mxu1 %v7748_v35  ;;  %v976_v6 = vsub.f32 %v7924_v38, %v7927_v53 }
  0xba   : > { %6509 = vmatprep.mubr.f32.mxu1 %v7907_v0 }
 0x14e   : > { %v6402_v8 = vpop.f32.mrf.mxu0 }
 0x150   : > { %v388_v19 = vpop.f32.mrf.mxu0 }
 0x156   : > { %v6421_v23 = vpop.f32.mrf.mxu1 }
 0x157   : > { %v516_v35 = vadd.f32 %v6421_v23, %v6402_v8 }
 0x158   : > { %v509_v30 = vpop.f32.mrf.mxu1 }
 0x159   : > { %v510_v40 = vadd.f32 %v509_v30, %v388_v19 }
 0x15f   : > { %v6440_v28 = vpop.f32.mrf.mxu0 }
 0x160   : > { %v611_v41 = vadd.f32 %v6440_v28, %v516_v35  ;;  %v7931_v28 = vand.u32 4294901760, %v976_v6 }
 0x161   : > { %v603_v31 = vpop.f32.mrf.mxu0 }
 0x162   : > { %v604_v46 = vadd.f32 %v603_v31, %v510_v40 }
 0x168   : > { %v6459_v32 = vpop.f32.mrf.mxu1 }
 0x169   : > { %v700_v51 = vadd.f32 %v6459_v32, %v611_v41 }
 0x16a   : > { %v691_v43 = vpop.f32.mrf.mxu1 }
 0x16b   : > { %v692_v56 = vadd.f32 %v691_v43, %v604_v46  ;;  %v7939_v43 = vld [vmem:[%s7661_s27 + $0x8] sm:$0xff] }
 0x16c   : > { %8690 = vst [vmem:[#allocation20_spill] sm:$0xff] %v7939_v43 }
 0x171   : > { %v6478_v39 = vpop.f32.mrf.mxu0 }
 0x172   : > { %v801_v57 = vadd.f32 %v6478_v39, %v700_v51  ;;  %v7936_v39 = vld [vmem:[%s7661_s27] sm:$0xff] }
 0x173   : > { %v794_v55 = vpop.f32.mrf.mxu0  ;;  %8689 = vst [vmem:[#allocation19_spill] sm:$0xff] %v7936_v39  ;;  %v1399_v51 = vsel %vm302_vm0, %v7936_v39, 0 }
 0x174   : > { %v795_v62 = vadd.f32 %v794_v55, %v692_v56  ;;  %v1402_v55 = vsel %vm302_vm0, %v7939_v43, 0  ;;  %v7947_v56 = vand.u32 4294901760, %v1399_v51 }
 0x179   : > { %v6497_v59 = vpop.f32.mrf.mxu1 }
 0x17a   : > { %v886_v63 = vadd.f32 %v6497_v59, %v801_v57  ;;  %v7950_v57 = vand.u32 4294901760, %v1402_v55  ;;  %v7956_v59 = vsub.f32 %v1399_v51, %v7947_v56 }
 0x17b   : > { %v879_v8 = vpop.f32.mrf.mxu1 }
 0x17c   : > { %v925_v14 = vand.u32 4294901760, %v886_v63  ;;  %v880_v23 = vadd.f32 %v879_v8, %v795_v62  ;;  %v7961_v62 = vsub.f32 %v1402_v55, %v7950_v57 }
 0x17e   : > { %v1013_v19 = vsub.f32 %v886_v63, %v925_v14  ;;  %v928_v24 = vand.u32 4294901760, %v880_v23  ;;  %6498 = vmatprep.subr.mxu0 %v925_v14  ;;  %v1479_v63 = vand.u32 4294901760, %v7956_v59  ;;  %v1489_v6 = vand.u32 4294901760, %v7961_v62 }
 0x17f   : > { %6499 = vmatpush3.msra.mxu0 %v925_v14 }
 0x180   : > { %v1020_v30 = vsub.f32 %v880_v23, %v928_v24  ;;  %6500 = vmatprep.subr.mxu0 %v928_v24  ;;  %v1014_v31 = vand.u32 4294901760, %v1013_v19  ;;  %v1480_v8 = vsub.f32 %v7956_v59, %v1479_v63 }
 0x181   : > { %6501 = vmatpush3.msra.mxu0 %v928_v24 }
 0x182   : > { %6512 = vmatprep.subr.mxu0 %v1013_v19  ;;  %6503 = vmatmul.mubr.f32.vlgmr.msra.gmra.mxu0 %v7931_v28  ;;  %v1015_v32 = vsub.f32 %v1013_v19, %v1014_v31  ;;  %v1021_v35 = vand.u32 4294901760, %v1020_v30  ;;  %v1481_v23 = vand.u32 4294901760, %v1480_v8 }
 0x183   : > { %6513 = vmatpush3.msra.mxu0 %v1013_v19  ;;  %6516 = vmatprep.mubr.f32.mxu0 %v7910_v1 }
 0x184   : > { %6514 = vmatprep.subr.mxu0 %v1020_v30  ;;  %v1016_v40 = vand.u32 4294901760, %v1015_v32  ;;  %v1022_v41 = vsub.f32 %v1020_v30, %v1021_v35 }
 0x185   : > { %6515 = vmatpush3.msra.mxu0 %v1020_v30 }
 0x186   : > { %6505 = vmatprep.subr.mxu1 %v1016_v40  ;;  %6526 = vmatprep.subr.mxu0 %v1014_v31  ;;  %v1023_v46 = vand.u32 4294901760, %v1022_v41 }
 0x187   : > { %6506 = vmatpush3.msra.mxu1 %v1016_v40  ;;  %6517 = vmatmul.mubr.f32.vlgmr.msra.gmra.mxu0 %v7924_v38 }
 0x188   : > { %6527 = vmatpush3.msra.mxu0 %v1014_v31  ;;  %6507 = vmatprep.subr.mxu1 %v1023_v46 }
 0x189   : > { %6528 = vmatprep.subr.mxu0 %v1021_v35  ;;  %6508 = vmatpush3.msra.mxu1 %v1023_v46 }
 0x18a   : > { %6529 = vmatpush3.msra.mxu0 %v1021_v35  ;;  %6510 = vmatmul.mubr.f32.vlgmr.msra.gmra.mxu1 %v7921_v29 }
 0x18b   : > { %6519 = vmatprep.subr.mxu1 %v925_v14  ;;  %6530 = vmatprep.mubr.f32.mxu0 %v7907_v0 }
 0x18c   : > { %6540 = vmatprep.subr.mxu0 %v7675_v3  ;;  %6520 = vmatpush3.msra.mxu1 %v925_v14 }
 0x18d   : > { %6531 = vmatmul.mubr.f32.vlgmr.msra.gmra.mxu0 %v7921_v29  ;;  %6521 = vmatprep.subr.mxu1 %v928_v24 }
 0x18e   : > { %6541 = vmatpush3.msra.mxu0 %v7675_v3  ;;  %6522 = vmatpush3.msra.mxu1 %v928_v24 }
 0x18f   : > { %6542 = vmatprep.subr.mxu0 %v7677_v4  ;;  %6523 = vmatprep.mubr.f32.mxu1 %v7914_v2 }
 0x190   : > { %6543 = vmatpush3.msra.mxu0 %v7677_v4  ;;  %6524 = vmatmul.mubr.f32.vlgmr.msra.gmra.mxu1 %v7927_v53 }
 0x191   : > { %6533 = vmatprep.subr.mxu1 %v925_v14  ;;  %6544 = vmatprep.subr.mxu0 %v7679_v5 }
 0x192   : > { %6534 = vmatpush3.msra.mxu1 %v925_v14  ;;  %6545 = vmatpush3.msra.mxu0 %v7679_v5  ;;  %v1490_v14 = vsub.f32 %v7961_v62, %v1489_v6 }
 0x193   : > { %6535 = vmatprep.subr.mxu1 %v928_v24  ;;  %6546 = vmatprep.subr.mxu0 %v7681_v9 }
 0x194   : > { %6536 = vmatpush3.msra.mxu1 %v928_v24  ;;  %6537 = vmatprep.mubr.f32.mxu1 %v7907_v0  ;;  %v1491_v19 = vand.u32 4294901760, %v1490_v14 }
 0x195   : > { %6547 = vmatpush3.msra.mxu0 %v7681_v9  ;;  %6538 = vmatmul.mubr.f32.vlgmr.msra.gmra.mxu1 %v7921_v29 }
 0x196   : > { %6548 = vmatprep.subr.mxu0 %v7683_v10  ;;  %6559 = vmatprep.subr.mxu1 %v7752_v36 }
 0x197   : > { %6549 = vmatpush3.msra.mxu0 %v7683_v10  ;;  %6560 = vmatpush3.msra.mxu1 %v7752_v36 }
 0x198   : > { %6550 = vmatprep.subr.mxu0 %v7702_v17  ;;  %6561 = vmatprep.subr.mxu1 %v7754_v37 }
 0x199   : > { %6551 = vmatpush3.msra.mxu0 %v7702_v17  ;;  %6562 = vmatpush3.msra.mxu1 %v7754_v37 }
 0x19a   : > { %6552 = vmatprep.subr.mxu0 %v7722_v25  ;;  %6563 = vmatprep.subr.mxu1 %v7767_v42 }
 0x19b   : > { %6553 = vmatpush3.msra.mxu0 %v7722_v25  ;;  %6564 = vmatpush3.msra.mxu1 %v7767_v42 }
 0x19c   : > { %6554 = vmatprep.subr.mxu0 %v7743_v33  ;;  %6565 = vmatprep.subr.mxu1 %v7786_v48 }
 0x19d   : > { %6555 = vmatpush3.msra.mxu0 %v7743_v33  ;;  %6566 = vmatpush3.msra.mxu1 %v7786_v48 }
 0x19e   : > { %6556 = vmatprep.mubr.f32.mxu0 %v1481_v23  ;;  %6567 = vmatprep.subr.mxu1 %v7804_v54 }
 0x19f   : > { %6578 = vmatprep.subr.mxu0 %v7690_v12  ;;  %6557 = vmatmul.mubr.f32.vlgmr.msra.gmra.mxu0 %v1491_v19 }
 0x1a0   : > { %6568 = vmatpush3.msra.mxu1 %v7804_v54  ;;  %6579 = vmatpush3.msra.mxu0 %v7690_v12 }
 0x1a1   : > { %6569 = vmatprep.subr.mxu1 %v7816_v58  ;;  %6580 = vmatprep.subr.mxu0 %v7693_v13 }
 0x1a2   : > { %6570 = vmatpush3.msra.mxu1 %v7816_v58  ;;  %6581 = vmatpush3.msra.mxu0 %v7693_v13 }
 0x1a3   : > { %6571 = vmatprep.subr.mxu1 %v7822_v60  ;;  %6582 = vmatprep.subr.mxu0 %v7696_v15 }
 0x1a4   : > { %6572 = vmatpush3.msra.mxu1 %v7822_v60  ;;  %6583 = vmatpush3.msra.mxu0 %v7696_v15 }
 0x1a5   : > { %6573 = vmatprep.subr.mxu1 %v7828_v61  ;;  %6584 = vmatprep.subr.mxu0 %v7705_v18 }
 0x1a6   : > { %6574 = vmatpush3.msra.mxu1 %v7828_v61  ;;  %6575 = vmatprep.mubr.f32.mxu1 %v7947_v56 }
 0x1a7   : > { %6585 = vmatpush3.msra.mxu0 %v7705_v18  ;;  %6576 = vmatmul.mubr.f32.vlgmr.msra.gmra.mxu1 %v7950_v57 }
 0x1a8   : > { %6586 = vmatprep.subr.mxu0 %v7728_v27  ;;  %6597 = vmatprep.subr.mxu1 %v7675_v3 }
 0x1a9   : > { %6587 = vmatpush3.msra.mxu0 %v7728_v27  ;;  %6598 = vmatpush3.msra.mxu1 %v7675_v3 }
 0x1aa   : > { %6588 = vmatprep.subr.mxu0 %v7773_v44  ;;  %6599 = vmatprep.subr.mxu1 %v7677_v4 }
 0x1ab   : > { %6589 = vmatpush3.msra.mxu0 %v7773_v44  ;;  %6600 = vmatpush3.msra.mxu1 %v7677_v4 }
 0x1ac   : > { %6590 = vmatprep.subr.mxu0 %v7776_v45  ;;  %6601 = vmatprep.subr.mxu1 %v7679_v5 }
 0x1ad   : > { %6591 = vmatpush3.msra.mxu0 %v7776_v45  ;;  %6602 = vmatpush3.msra.mxu1 %v7679_v5 }
 0x1ae   : > { %6592 = vmatprep.subr.mxu0 %v7782_v47  ;;  %6603 = vmatprep.subr.mxu1 %v7681_v9 }
 0x1af   : > { %6593 = vmatpush3.msra.mxu0 %v7782_v47  ;;  %6594 = vmatprep.mubr.f32.mxu0 %v7956_v59 }
 0x1b0   : > { %6604 = vmatpush3.msra.mxu1 %v7681_v9  ;;  %6595 = vmatmul.mubr.f32.vlgmr.msra.gmra.mxu0 %v7961_v62 }
 0x1b1   : > { %6605 = vmatprep.subr.mxu1 %v7683_v10  ;;  %6616 = vmatprep.subr.mxu0 %v7711_v20 }
 0x1b2   : > { %6606 = vmatpush3.msra.mxu1 %v7683_v10  ;;  %6617 = vmatpush3.msra.mxu0 %v7711_v20 }
 0x1b3   : > { %6607 = vmatprep.subr.mxu1 %v7702_v17  ;;  %6618 = vmatprep.subr.mxu0 %v7714_v21 }
 0x1b4   : > { %6608 = vmatpush3.msra.mxu1 %v7702_v17  ;;  %6619 = vmatpush3.msra.mxu0 %v7714_v21 }
 0x1b5   : > { %6609 = vmatprep.subr.mxu1 %v7722_v25  ;;  %6620 = vmatprep.subr.mxu0 %v7717_v22 }
 0x1b6   : > { %6610 = vmatpush3.msra.mxu1 %v7722_v25  ;;  %6621 = vmatpush3.msra.mxu0 %v7717_v22 }
 0x1b7   : > { %6611 = vmatprep.subr.mxu1 %v7743_v33  ;;  %6622 = vmatprep.subr.mxu0 %v7725_v26 }
 0x1b8   : > { %6612 = vmatpush3.msra.mxu1 %v7743_v33  ;;  %6613 = vmatprep.mubr.f32.mxu1 %v1479_v63 }
 0x1b9   : > { %6623 = vmatpush3.msra.mxu0 %v7725_v26  ;;  %6614 = vmatmul.mubr.f32.vlgmr.msra.gmra.mxu1 %v1489_v6 }
 0x1ba   : > { %6624 = vmatprep.subr.mxu0 %v7746_v34  ;;  %6635 = vmatprep.subr.mxu1 %v7675_v3 }
 0x1bb   : > { %6625 = vmatpush3.msra.mxu0 %v7746_v34  ;;  %6636 = vmatpush3.msra.mxu1 %v7675_v3 }
 0x1bc   : > { %6626 = vmatprep.subr.mxu0 %v7789_v49  ;;  %6637 = vmatprep.subr.mxu1 %v7677_v4 }
 0x1bd   : > { %6627 = vmatpush3.msra.mxu0 %v7789_v49  ;;  %6638 = vmatpush3.msra.mxu1 %v7677_v4 }
 0x1be   : > { %6628 = vmatprep.subr.mxu0 %v7792_v50  ;;  %6639 = vmatprep.subr.mxu1 %v7679_v5 }
 0x1bf   : > { %6629 = vmatpush3.msra.mxu0 %v7792_v50  ;;  %6640 = vmatpush3.msra.mxu1 %v7679_v5 }
 0x1c0   : > { %6630 = vmatprep.subr.mxu0 %v7800_v52  ;;  %6641 = vmatprep.subr.mxu1 %v7681_v9 }
 0x1c1   : > { %6631 = vmatpush3.msra.mxu0 %v7800_v52  ;;  %6632 = vmatprep.mubr.f32.mxu0 %v7947_v56 }
 0x1c2   : > { %6642 = vmatpush3.msra.mxu1 %v7681_v9  ;;  %6633 = vmatmul.mubr.f32.vlgmr.msra.gmra.mxu0 %v7950_v57 }
 0x1c3   : > { %6643 = vmatprep.subr.mxu1 %v7683_v10  ;;  %6651 = vmatprep.mubr.f32.mxu1 %v7947_v56 }
 0x1c4   : > { %6644 = vmatpush3.msra.mxu1 %v7683_v10  ;;  %6658 = vmatprep.mubr.f32.mxu0 %v7918_v7 }
 0x1c5   : > { %6645 = vmatprep.subr.mxu1 %v7702_v17 }
 0x1c6   : > { %6646 = vmatpush3.msra.mxu1 %v7702_v17 }
 0x1c7   : > { %6647 = vmatprep.subr.mxu1 %v7722_v25 }
 0x1c8   : > { %6648 = vmatpush3.msra.mxu1 %v7722_v25 }
 0x1c9   : > { %6649 = vmatprep.subr.mxu1 %v7743_v33 }
 0x1ca   : > { %6650 = vmatpush3.msra.mxu1 %v7743_v33 }
 0x1cb   : > { %6652 = vmatmul.mubr.f32.vlgmr.msra.gmra.mxu1 %v7950_v57 }
 0x1cc   : > { %6665 = vmatprep.mubr.f32.mxu1 %v7907_v0 }
 0x242   : > { %v6504_v24 = vpop.f32.mrf.mxu0 }
 0x244   : > { %v969_v30 = vpop.f32.mrf.mxu0 }
 0x247   : > { %v6518_v31 = vpop.f32.mrf.mxu0 }
 0x249   : > { %v1142_v35 = vpop.f32.mrf.mxu0 }
 0x24a   : > { %v6511_v32 = vpop.f32.mrf.mxu1 }
 0x24b   : > { %v1067_v40 = vadd.f32 %v6511_v32, %v6504_v24 }
 0x24c   : > { %v1060_v41 = vpop.f32.mrf.mxu1 }
 0x24d   : > { %v1150_v46 = vadd.f32 %v6518_v31, %v1067_v40  ;;  %v1061_v51 = vadd.f32 %v1060_v41, %v969_v30  ;;  %v6532_v55 = vpop.f32.mrf.mxu0 }
 0x24f   : > { %v1143_v56 = vadd.f32 %v1142_v35, %v1061_v51  ;;  %v1309_v6 = vpop.f32.mrf.mxu0 }
 0x250   : > { %v6525_v59 = vpop.f32.mrf.mxu1 }
 0x251   : > { %v1233_v62 = vadd.f32 %v6525_v59, %v1150_v46 }
 0x252   : > { %v1224_v63 = vpop.f32.mrf.mxu1 }
 0x253   : > { %v1316_v8 = vadd.f32 %v6532_v55, %v1233_v62  ;;  %v1225_v14 = vadd.f32 %v1224_v63, %v1143_v56 }
 0x255   : > { %v1310_v57 = vadd.f32 %v1309_v6, %v1225_v14  ;;  %v6539_v23 = vpop.f32.mrf.mxu1 }
 0x256   : > { %v8081_v19 = vadd.f32 %v6539_v23, %v1316_v8 }
 0x257   : > { %v1388_v43 = vpop.f32.mrf.mxu1 }
 0x258   : > { %8691 = vst [vmem:[#allocation21_spill] sm:$0xff] %v8081_v19  ;;  %v8083_v39 = vadd.f32 %v1388_v43, %v1310_v57 }
 0x25a   : > { %8692 = vst [vmem:[#allocation22_spill] sm:$0xff] %v8083_v39 }
 0x25f   : > { %v6558_v7 = vpop.f32.mrf.mxu0 }
 0x261   : > { %v1483_v24 = vpop.f32.mrf.mxu0 }
 0x267   : > { %v6577_v32 = vpop.f32.mrf.mxu1 }
 0x268   : > { %v1611_v41 = vadd.f32 %v6577_v32, %v6558_v7 }
 0x269   : > { %v1604_v30 = vpop.f32.mrf.mxu1 }
 0x26a   : > { %v1605_v51 = vadd.f32 %v1604_v30, %v1483_v24  ;;  %v2486_v30 = vmul.f32 %v7686_v11, %v7686_v11 }
 0x270   : > { %v6596_v31 = vpop.f32.mrf.mxu0 }
 0x271   : > { %v1706_v59 = vadd.f32 %v6596_v31, %v1611_v41 }
 0x272   : > { %v1698_v40 = vpop.f32.mrf.mxu0 }
 0x273   : > { %v1699_v56 = vadd.f32 %v1698_v40, %v1605_v51  ;;  %v2487_v40 = vmul.f32 %v7699_v16, %v7699_v16 }
 0x275   : > { %v2492_v11 = vsel %vm302_vm0, %v2487_v40, 0 }
 0x279   : > { %v6615_v35 = vpop.f32.mrf.mxu1 }
 0x27a   : > { %v1795_v62 = vadd.f32 %v6615_v35, %v1706_v59 }
 0x27b   : > { %v1786_v55 = vpop.f32.mrf.mxu1 }
 0x27c   : > { %v1787_v6 = vadd.f32 %v1786_v55, %v1699_v56 }
 0x282   : > { %v6634_v46 = vpop.f32.mrf.mxu0 }
 0x283   : > { %v1896_v8 = vadd.f32 %v6634_v46, %v1795_v62  ;;  %v2489_v46 = vsel %vm302_vm0, %v2486_v30, 0 }
 0x284   : > { %v1889_v63 = vpop.f32.mrf.mxu0  ;;  %v8095_v16 = vand.u32 4294901760, %v2489_v46 }
 0x285   : > { %v1890_v43 = vadd.f32 %v1889_v63, %v1787_v6  ;;  %v8693_v6 = vld [vmem:[#allocation16_spill] sm:$0xff] }
 0x286   : > { %v8104_v51 = vsub.f32 %v2489_v46, %v8095_v16 }
 0x288   : > { %v2569_v55 = vand.u32 4294901760, %v8104_v51 }
 0x28b   : > { %v6653_v14 = vpop.f32.mrf.mxu1 }
 0x28c   : > { %v1981_v57 = vadd.f32 %v6653_v14, %v1896_v8  ;;  %v8694_v8 = vld [vmem:[#allocation17_spill] sm:$0xff]  ;;  %v8695_v14 = vld [vmem:[#allocation18_spill] sm:$0xff] }
 0x28d   : > { %v1974_v23 = vpop.f32.mrf.mxu1 }
 0x28e   : > { %v2013_v39 = vand.u32 4294901760, %v1981_v57  ;;  %v1975_v19 = vadd.f32 %v1974_v23, %v1890_v43 }
 0x290   : > { %v2101_v52 = vsub.f32 %v1981_v57, %v2013_v39  ;;  %v2016_v50 = vand.u32 4294901760, %v1975_v19  ;;  %6654 = vmatprep.subr.mxu0 %v2013_v39 }
 0x291   : > { %6655 = vmatpush3.msra.mxu0 %v2013_v39 }
 0x292   : > { %v2108_v7 = vsub.f32 %v1975_v19, %v2016_v50  ;;  %6656 = vmatprep.subr.mxu0 %v2016_v50  ;;  %v2102_v24 = vand.u32 4294901760, %v2101_v52 }
 0x293   : > { %6657 = vmatpush3.msra.mxu0 %v2016_v50 }
 0x294   : > { %6668 = vmatprep.subr.mxu0 %v2101_v52  ;;  %6659 = vmatmul.mubr.f32.vlgmr.msra.gmra.mxu0 %v7931_v28  ;;  %v2103_v32 = vsub.f32 %v2101_v52, %v2102_v24  ;;  %v2109_v31 = vand.u32 4294901760, %v2108_v7 }
 0x295   : > { %6669 = vmatpush3.msra.mxu0 %v2101_v52  ;;  %6672 = vmatprep.mubr.f32.mxu0 %v7910_v1  ;;  %v8098_v52 = vand.u32 4294901760, %v2492_v11 }
 0x296   : > { %6670 = vmatprep.subr.mxu0 %v2108_v7  ;;  %v2104_v35 = vand.u32 4294901760, %v2103_v32  ;;  %v2110_v19 = vsub.f32 %v2108_v7, %v2109_v31 }
 0x297   : > { %6671 = vmatpush3.msra.mxu0 %v2108_v7  ;;  %v8109_v59 = vsub.f32 %v2492_v11, %v8098_v52 }
 0x298   : > { %6661 = vmatprep.subr.mxu1 %v2104_v35  ;;  %6682 = vmatprep.subr.mxu0 %v2102_v24  ;;  %v2111_v41 = vand.u32 4294901760, %v2110_v19 }
 0x299   : > { %6662 = vmatpush3.msra.mxu1 %v2104_v35  ;;  %6673 = vmatmul.mubr.f32.vlgmr.msra.gmra.mxu0 %v7924_v38  ;;  %v2579_v56 = vand.u32 4294901760, %v8109_v59 }
 0x29a   : > { %6683 = vmatpush3.msra.mxu0 %v2102_v24  ;;  %6663 = vmatprep.subr.mxu1 %v2111_v41 }
 0x29b   : > { %6684 = vmatprep.subr.mxu0 %v2109_v31  ;;  %6664 = vmatpush3.msra.mxu1 %v2111_v41 }
 0x29c   : > { %6685 = vmatpush3.msra.mxu0 %v2109_v31  ;;  %6666 = vmatmul.mubr.f32.vlgmr.msra.gmra.mxu1 %v7921_v29 }
 0x29d   : > { %6675 = vmatprep.subr.mxu1 %v2013_v39  ;;  %6686 = vmatprep.mubr.f32.mxu0 %v7907_v0 }
 0x29e   : > { %6696 = vmatprep.subr.mxu0 %v7675_v3  ;;  %6676 = vmatpush3.msra.mxu1 %v2013_v39 }
 0x29f   : > { %6687 = vmatmul.mubr.f32.vlgmr.msra.gmra.mxu0 %v7921_v29  ;;  %6677 = vmatprep.subr.mxu1 %v2016_v50 }
 0x2a0   : > { %6697 = vmatpush3.msra.mxu0 %v7675_v3  ;;  %6678 = vmatpush3.msra.mxu1 %v2016_v50 }
 0x2a1   : > { %6698 = vmatprep.subr.mxu0 %v7677_v4  ;;  %6679 = vmatprep.mubr.f32.mxu1 %v7914_v2 }
 0x2a2   : > { %6699 = vmatpush3.msra.mxu0 %v7677_v4  ;;  %6680 = vmatmul.mubr.f32.vlgmr.msra.gmra.mxu1 %v7927_v53 }
 0x2a3   : > { %6689 = vmatprep.subr.mxu1 %v2013_v39  ;;  %6700 = vmatprep.subr.mxu0 %v7679_v5 }
 0x2a4   : > { %6690 = vmatpush3.msra.mxu1 %v2013_v39  ;;  %6701 = vmatpush3.msra.mxu0 %v7679_v5  ;;  %v2570_v39 = vsub.f32 %v8104_v51, %v2569_v55 }
 0x2a5   : > { %6691 = vmatprep.subr.mxu1 %v2016_v50  ;;  %6702 = vmatprep.subr.mxu0 %v7681_v9 }
 0x2a6   : > { %6692 = vmatpush3.msra.mxu1 %v2016_v50  ;;  %6693 = vmatprep.mubr.f32.mxu1 %v7907_v0  ;;  %v2580_v50 = vsub.f32 %v8109_v59, %v2579_v56  ;;  %v2571_v62 = vand.u32 4294901760, %v2570_v39 }
 0x2a7   : > { %6703 = vmatpush3.msra.mxu0 %v7681_v9  ;;  %6694 = vmatmul.mubr.f32.vlgmr.msra.gmra.mxu1 %v7921_v29 }
 0x2a8   : > { %6704 = vmatprep.subr.mxu0 %v7683_v10  ;;  %6715 = vmatprep.subr.mxu1 %v7752_v36  ;;  %v2581_v63 = vand.u32 4294901760, %v2580_v50 }
 0x2a9   : > { %6705 = vmatpush3.msra.mxu0 %v7683_v10  ;;  %6716 = vmatpush3.msra.mxu1 %v7752_v36 }
 0x2aa   : > { %6706 = vmatprep.subr.mxu0 %v7702_v17  ;;  %6717 = vmatprep.subr.mxu1 %v7754_v37 }
 0x2ab   : > { %6707 = vmatpush3.msra.mxu0 %v7702_v17  ;;  %6718 = vmatpush3.msra.mxu1 %v7754_v37 }
 0x2ac   : > { %6708 = vmatprep.subr.mxu0 %v7722_v25  ;;  %6719 = vmatprep.subr.mxu1 %v7767_v42 }
 0x2ad   : > { %6709 = vmatpush3.msra.mxu0 %v7722_v25  ;;  %6720 = vmatpush3.msra.mxu1 %v7767_v42 }
 0x2ae   : > { %6710 = vmatprep.subr.mxu0 %v7743_v33  ;;  %6721 = vmatprep.subr.mxu1 %v7786_v48 }
 0x2af   : > { %6711 = vmatpush3.msra.mxu0 %v7743_v33  ;;  %6722 = vmatpush3.msra.mxu1 %v7786_v48 }
 0x2b0   : > { %6712 = vmatprep.mubr.f32.mxu0 %v2571_v62  ;;  %6723 = vmatprep.subr.mxu1 %v7804_v54  ;;  %v8697_v62 = vld [vmem:[#allocation22_spill] sm:$0xff] }
 0x2b1   : > { %6734 = vmatprep.subr.mxu0 %v7690_v12  ;;  %6713 = vmatmul.mubr.f32.vlgmr.msra.gmra.mxu0 %v2581_v63  ;;  %v5768_v63 = vmul.f32 2.0, %v8697_v62 }
 0x2b2   : > { %6724 = vmatpush3.msra.mxu1 %v7804_v54  ;;  %6735 = vmatpush3.msra.mxu0 %v7690_v12 }
 0x2b3   : > { %6725 = vmatprep.subr.mxu1 %v7816_v58  ;;  %6736 = vmatprep.subr.mxu0 %v7693_v13 }
 0x2b4   : > { %6726 = vmatpush3.msra.mxu1 %v7816_v58  ;;  %6737 = vmatpush3.msra.mxu0 %v7693_v13 }
 0x2b5   : > { %6727 = vmatprep.subr.mxu1 %v7822_v60  ;;  %6738 = vmatprep.subr.mxu0 %v7696_v15 }
 0x2b6   : > { %6728 = vmatpush3.msra.mxu1 %v7822_v60  ;;  %6739 = vmatpush3.msra.mxu0 %v7696_v15 }
 0x2b7   : > { %6729 = vmatprep.subr.mxu1 %v7828_v61  ;;  %6740 = vmatprep.subr.mxu0 %v7705_v18 }
 0x2b8   : > { %6730 = vmatpush3.msra.mxu1 %v7828_v61  ;;  %6731 = vmatprep.mubr.f32.mxu1 %v8095_v16 }
 0x2b9   : > { %6741 = vmatpush3.msra.mxu0 %v7705_v18  ;;  %6732 = vmatmul.mubr.f32.vlgmr.msra.gmra.mxu1 %v8098_v52 }
 0x2ba   : > { %6742 = vmatprep.subr.mxu0 %v7728_v27  ;;  %6753 = vmatprep.subr.mxu1 %v7675_v3 }
 0x2bb   : > { %6743 = vmatpush3.msra.mxu0 %v7728_v27  ;;  %6754 = vmatpush3.msra.mxu1 %v7675_v3 }
 0x2bc   : > { %6744 = vmatprep.subr.mxu0 %v7773_v44  ;;  %6755 = vmatprep.subr.mxu1 %v7677_v4 }
 0x2bd   : > { %6745 = vmatpush3.msra.mxu0 %v7773_v44  ;;  %6756 = vmatpush3.msra.mxu1 %v7677_v4 }
 0x2be   : > { %6746 = vmatprep.subr.mxu0 %v7776_v45  ;;  %6757 = vmatprep.subr.mxu1 %v7679_v5 }
 0x2bf   : > { %6747 = vmatpush3.msra.mxu0 %v7776_v45  ;;  %6758 = vmatpush3.msra.mxu1 %v7679_v5 }
 0x2c0   : > { %6748 = vmatprep.subr.mxu0 %v7782_v47  ;;  %6759 = vmatprep.subr.mxu1 %v7681_v9 }
 0x2c1   : > { %6749 = vmatpush3.msra.mxu0 %v7782_v47  ;;  %6750 = vmatprep.mubr.f32.mxu0 %v8104_v51 }
 0x2c2   : > { %6760 = vmatpush3.msra.mxu1 %v7681_v9  ;;  %6751 = vmatmul.mubr.f32.vlgmr.msra.gmra.mxu0 %v8109_v59 }
 0x2c3   : > { %6761 = vmatprep.subr.mxu1 %v7683_v10  ;;  %6772 = vmatprep.subr.mxu0 %v7711_v20 }
 0x2c4   : > { %6762 = vmatpush3.msra.mxu1 %v7683_v10  ;;  %6773 = vmatpush3.msra.mxu0 %v7711_v20 }
 0x2c5   : > { %6763 = vmatprep.subr.mxu1 %v7702_v17  ;;  %6774 = vmatprep.subr.mxu0 %v7714_v21 }
 0x2c6   : > { %6764 = vmatpush3.msra.mxu1 %v7702_v17  ;;  %6775 = vmatpush3.msra.mxu0 %v7714_v21 }
 0x2c7   : > { %6765 = vmatprep.subr.mxu1 %v7722_v25  ;;  %6776 = vmatprep.subr.mxu0 %v7717_v22 }
 0x2c8   : > { %6766 = vmatpush3.msra.mxu1 %v7722_v25  ;;  %6777 = vmatpush3.msra.mxu0 %v7717_v22 }
 0x2c9   : > { %6767 = vmatprep.subr.mxu1 %v7743_v33  ;;  %6778 = vmatprep.subr.mxu0 %v7725_v26 }
 0x2ca   : > { %6768 = vmatpush3.msra.mxu1 %v7743_v33  ;;  %6769 = vmatprep.mubr.f32.mxu1 %v2569_v55 }
 0x2cb   : > { %6779 = vmatpush3.msra.mxu0 %v7725_v26  ;;  %6770 = vmatmul.mubr.f32.vlgmr.msra.gmra.mxu1 %v2579_v56  ;;  %v8696_v56 = vld [vmem:[#allocation21_spill] sm:$0xff] }
 0x2cc   : > { %6780 = vmatprep.subr.mxu0 %v7746_v34  ;;  %6791 = vmatprep.subr.mxu1 %v7675_v3  ;;  %v5769_v39 = vmul.f32 2.0, %v8696_v56 }
 0x2cd   : > { %6781 = vmatpush3.msra.mxu0 %v7746_v34  ;;  %6792 = vmatpush3.msra.mxu1 %v7675_v3 }
 0x2ce   : > { %6782 = vmatprep.subr.mxu0 %v7789_v49  ;;  %6793 = vmatprep.subr.mxu1 %v7677_v4 }
 0x2cf   : > { %6783 = vmatpush3.msra.mxu0 %v7789_v49  ;;  %6794 = vmatpush3.msra.mxu1 %v7677_v4 }
 0x2d0   : > { %6784 = vmatprep.subr.mxu0 %v8693_v6  ;;  %6795 = vmatprep.subr.mxu1 %v7679_v5 }
 0x2d1   : > { %6785 = vmatpush3.msra.mxu0 %v8693_v6  ;;  %6796 = vmatpush3.msra.mxu1 %v7679_v5 }
 0x2d2   : > { %6786 = vmatprep.subr.mxu0 %v8694_v8  ;;  %6797 = vmatprep.subr.mxu1 %v7681_v9 }
 0x2d3   : > { %6787 = vmatpush3.msra.mxu0 %v8694_v8  ;;  %6788 = vmatprep.mubr.f32.mxu0 %v8095_v16 }
 0x2d4   : > { %6798 = vmatpush3.msra.mxu1 %v7681_v9  ;;  %6789 = vmatmul.mubr.f32.vlgmr.msra.gmra.mxu0 %v8098_v52 }
 0x2d5   : > { %6799 = vmatprep.subr.mxu1 %v7683_v10  ;;  %6807 = vmatprep.mubr.f32.mxu1 %v8095_v16 }
 0x2d6   : > { %6800 = vmatpush3.msra.mxu1 %v7683_v10  ;;  %6814 = vmatprep.mubr.f32.mxu0 %v8695_v14 }
 0x2d7   : > { %6801 = vmatprep.subr.mxu1 %v7702_v17 }
 0x2d8   : > { %6802 = vmatpush3.msra.mxu1 %v7702_v17 }
 0x2d9   : > { %6803 = vmatprep.subr.mxu1 %v7722_v25 }
 0x2da   : > { %6804 = vmatpush3.msra.mxu1 %v7722_v25 }
 0x2db   : > { %6805 = vmatprep.subr.mxu1 %v7743_v33 }
 0x2dc   : > { %6806 = vmatpush3.msra.mxu1 %v7743_v33 }
 0x2dd   : > { %6808 = vmatmul.mubr.f32.vlgmr.msra.gmra.mxu1 %v8098_v52 }
 0x2de   : > { %6821 = vmatprep.mubr.f32.mxu1 %v7907_v0 }
 0x354   : > { %v6660_v43 = vpop.f32.mrf.mxu0 }
 0x356   : > { %v2057_v57 = vpop.f32.mrf.mxu0 }
 0x359   : > { %v6674_v23 = vpop.f32.mrf.mxu0 }
 0x35b   : > { %v2230_v24 = vpop.f32.mrf.mxu0 }
 0x35c   : > { %v6667_v7 = vpop.f32.mrf.mxu1 }
 0x35d   : > { %v2155_v32 = vadd.f32 %v6667_v7, %v6660_v43  ;;  %v8233_v43 = vmul.f32 %v8696_v56, %v8696_v56 }
 0x35e   : > { %v2148_v31 = vpop.f32.mrf.mxu1 }
 0x35f   : > { %v2238_v30 = vadd.f32 %v6674_v23, %v2155_v32  ;;  %v2149_v40 = vadd.f32 %v2148_v31, %v2057_v57  ;;  %v6688_v35 = vpop.f32.mrf.mxu0  ;;  %8698 = vst [vmem:[#allocation16_spill] sm:$0xff] %v8233_v43  ;;  %v8246_v31 = vmul.f32 %v8697_v62, %v8697_v62 }
 0x361   : > { %v2231_v19 = vadd.f32 %v2230_v24, %v2149_v40  ;;  %v2397_v16 = vpop.f32.mrf.mxu0  ;;  %8703 = vst [vmem:[#allocation24_spill] sm:$0xff] %v8246_v31 }
 0x362   : > { %v6681_v41 = vpop.f32.mrf.mxu1 }
 0x363   : > { %v2321_v46 = vadd.f32 %v6681_v41, %v2238_v30 }
 0x364   : > { %v2312_v11 = vpop.f32.mrf.mxu1 }
 0x365   : > { %v2404_v51 = vadd.f32 %v6688_v35, %v2321_v46  ;;  %v2313_v59 = vadd.f32 %v2312_v11, %v2231_v19 }
 0x367   : > { %v2398_v52 = vadd.f32 %v2397_v16, %v2313_v59  ;;  %v6695_v55 = vpop.f32.mrf.mxu1 }
 0x368   : > { %v2483_v50 = vadd.f32 %v6695_v55, %v2404_v51 }
 0x369   : > { %v2476_v14 = vpop.f32.mrf.mxu1 }
 0x36a   : > { %v8235_v57 = vmul.f32 %v5769_v39, %v2483_v50  ;;  %v2477_v23 = vadd.f32 %v2476_v14, %v2398_v52  ;;  %v8237_v7 = vmul.f32 %v2483_v50, %v2483_v50  ;;  %v8240_v24 = vmul.f32 %v2483_v50, %v8696_v56 }
 0x36c   : > { %8699 = vst [vmem:[#allocation17_spill] sm:$0xff] %v8235_v57  ;;  %8700 = vst [vmem:[#allocation21_spill] sm:$0xff] %v8237_v7  ;;  %v8242_v32 = vmul.f32 %v5768_v63, %v2477_v23  ;;  %v8250_v30 = vadd.f32 %v8237_v7, %v8233_v43  ;;  %v8252_v40 = vmul.f32 %v2477_v23, %v2477_v23 }
 0x36d   : > { %8701 = vst [vmem:[#allocation22_spill] sm:$0xff] %v8240_v24  ;;  %v8255_v35 = vmul.f32 %v2477_v23, %v8697_v62 }
 0x36e   : > { %8702 = vst [vmem:[#allocation23_spill] sm:$0xff] %v8242_v32  ;;  %8704 = vst [vmem:[#allocation25_spill] sm:$0xff] %v8250_v30  ;;  %v8259_v14 = vadd.f32 %v8252_v40, %v8246_v31 }
 0x36f   : > { %8705 = vst [vmem:[#allocation26_spill] sm:$0xff] %v8252_v40  ;;  %8706 = vst [vmem:[#allocation27_spill] sm:$0xff] %v8255_v35 }
 0x370   : > { %8707 = vst [vmem:[#allocation28_spill] sm:$0xff] %v8259_v14 }
 0x371   : > { %v6714_v19 = vpop.f32.mrf.mxu0 }
 0x373   : > { %v2573_v41 = vpop.f32.mrf.mxu0 }
 0x379   : > { %v6733_v46 = vpop.f32.mrf.mxu1 }
 0x37a   : > { %v2701_v52 = vadd.f32 %v6733_v46, %v6714_v19 }
 0x37b   : > { %v2694_v16 = vpop.f32.mrf.mxu1 }
 0x37c   : > { %v2695_v56 = vadd.f32 %v2694_v16, %v2573_v41 }
 0x382   : > { %v6752_v11 = vpop.f32.mrf.mxu0 }
 0x383   : > { %v2796_v39 = vadd.f32 %v6752_v11, %v2701_v52 }
 0x384   : > { %v2788_v51 = vpop.f32.mrf.mxu0 }
 0x385   : > { %v2789_v63 = vadd.f32 %v2788_v51, %v2695_v56 }
 0x38b   : > { %v6771_v59 = vpop.f32.mrf.mxu1 }
 0x38c   : > { %v2885_v32 = vadd.f32 %v6771_v59, %v2796_v39 }
 0x38d   : > { %v2876_v50 = vpop.f32.mrf.mxu1 }
 0x38e   : > { %v2877_v23 = vadd.f32 %v2876_v50, %v2789_v63 }
 0x394   : > { %v6790_v55 = vpop.f32.mrf.mxu0 }
 0x395   : > { %v2986_v57 = vadd.f32 %v6790_v55, %v2885_v32 }
 0x396   : > { %v2979_v62 = vpop.f32.mrf.mxu0 }
 0x397   : > { %v2980_v24 = vadd.f32 %v2979_v62, %v2877_v23  ;;  %v8710_v62 = vld [vmem:[#allocation18_spill] sm:$0xff] }
 0x39d   : > { %v6809_v35 = vpop.f32.mrf.mxu1 }
 0x39e   : > { %v3071_v14 = vadd.f32 %v6809_v35, %v2986_v57  ;;  %v8708_v57 = vld [vmem:[#allocation19_spill] sm:$0xff]  ;;  %v8709_v35 = vld [vmem:[#allocation20_spill] sm:$0xff] }
 0x39f   : > { %v3064_v30 = vpop.f32.mrf.mxu1  ;;  %v3580_v32 = vmul.f32 %v8708_v57, %v8708_v57 }
 0x3a0   : > { %v3103_v40 = vand.u32 4294901760, %v3071_v14  ;;  %v3065_v7 = vadd.f32 %v3064_v30, %v2980_v24 }
 0x3a2   : > { %v3191_v31 = vsub.f32 %v3071_v14, %v3103_v40  ;;  %v3106_v43 = vand.u32 4294901760, %v3065_v7  ;;  %6810 = vmatprep.subr.mxu0 %v3103_v40 }
 0x3a3   : > { %6811 = vmatpush3.msra.mxu0 %v3103_v40 }
 0x3a4   : > { %v3198_v19 = vsub.f32 %v3065_v7, %v3106_v43  ;;  %6812 = vmatprep.subr.mxu0 %v3106_v43  ;;  %v3192_v41 = vand.u32 4294901760, %v3191_v31  ;;  %v3581_v7 = vmul.f32 %v8709_v35, %v8709_v35 }
 0x3a5   : > { %6813 = vmatpush3.msra.mxu0 %v3106_v43 }
 0x3a6   : > { %6824 = vmatprep.subr.mxu0 %v3191_v31  ;;  %6815 = vmatmul.mubr.f32.vlgmr.msra.gmra.mxu0 %v7931_v28  ;;  %v3193_v46 = vsub.f32 %v3191_v31, %v3192_v41  ;;  %v3199_v11 = vand.u32 4294901760, %v3198_v19  ;;  %v3586_v16 = vsel %vm302_vm0, %v3581_v7, 0 }
 0x3a7   : > { %6825 = vmatpush3.msra.mxu0 %v3191_v31  ;;  %6828 = vmatprep.mubr.f32.mxu0 %v7910_v1  ;;  %v3583_v31 = vsel %vm302_vm0, %v3580_v32, 0  ;;  %v8274_v59 = vand.u32 4294901760, %v3586_v16 }
 0x3a8   : > { %6826 = vmatprep.subr.mxu0 %v3198_v19  ;;  %v3194_v24 = vand.u32 4294901760, %v3193_v46  ;;  %v3200_v30 = vsub.f32 %v3198_v19, %v3199_v11  ;;  %v8271_v51 = vand.u32 4294901760, %v3583_v31 }
 0x3a9   : > { %6827 = vmatpush3.msra.mxu0 %v3198_v19  ;;  %v8285_v55 = vsub.f32 %v3586_v16, %v8274_v59 }
 0x3aa   : > { %6817 = vmatprep.subr.mxu1 %v3194_v24  ;;  %6838 = vmatprep.subr.mxu0 %v3192_v41  ;;  %v3201_v14 = vand.u32 4294901760, %v3200_v30  ;;  %v8280_v52 = vsub.f32 %v3583_v31, %v8271_v51 }
 0x3ab   : > { %6818 = vmatpush3.msra.mxu1 %v3194_v24  ;;  %6829 = vmatmul.mubr.f32.vlgmr.msra.gmra.mxu0 %v7924_v38  ;;  %v3673_v39 = vand.u32 4294901760, %v8285_v55 }
 0x3ac   : > { %6839 = vmatpush3.msra.mxu0 %v3192_v41  ;;  %6819 = vmatprep.subr.mxu1 %v3201_v14  ;;  %v3663_v56 = vand.u32 4294901760, %v8280_v52 }
 0x3ad   : > { %6840 = vmatprep.subr.mxu0 %v3199_v11  ;;  %6820 = vmatpush3.msra.mxu1 %v3201_v14 }
 0x3ae   : > { %6841 = vmatpush3.msra.mxu0 %v3199_v11  ;;  %6822 = vmatmul.mubr.f32.vlgmr.msra.gmra.mxu1 %v7921_v29 }
 0x3af   : > { %6831 = vmatprep.subr.mxu1 %v3103_v40  ;;  %6842 = vmatprep.mubr.f32.mxu0 %v7907_v0 }
 0x3b0   : > { %6852 = vmatprep.subr.mxu0 %v7675_v3  ;;  %6832 = vmatpush3.msra.mxu1 %v3103_v40 }
 0x3b1   : > { %6843 = vmatmul.mubr.f32.vlgmr.msra.gmra.mxu0 %v7921_v29  ;;  %6833 = vmatprep.subr.mxu1 %v3106_v43 }
 0x3b2   : > { %6853 = vmatpush3.msra.mxu0 %v7675_v3  ;;  %6834 = vmatpush3.msra.mxu1 %v3106_v43 }
 0x3b3   : > { %6854 = vmatprep.subr.mxu0 %v7677_v4  ;;  %6835 = vmatprep.mubr.f32.mxu1 %v7914_v2 }
 0x3b4   : > { %6855 = vmatpush3.msra.mxu0 %v7677_v4  ;;  %6836 = vmatmul.mubr.f32.vlgmr.msra.gmra.mxu1 %v7927_v53 }
 0x3b5   : > { %6845 = vmatprep.subr.mxu1 %v3103_v40  ;;  %6856 = vmatprep.subr.mxu0 %v7679_v5 }
 0x3b6   : > { %6846 = vmatpush3.msra.mxu1 %v3103_v40  ;;  %6857 = vmatpush3.msra.mxu0 %v7679_v5  ;;  %v3664_v40 = vsub.f32 %v8280_v52, %v3663_v56 }
 0x3b7   : > { %6847 = vmatprep.subr.mxu1 %v3106_v43  ;;  %6858 = vmatprep.subr.mxu0 %v7681_v9 }
 0x3b8   : > { %6848 = vmatpush3.msra.mxu1 %v3106_v43  ;;  %6849 = vmatprep.mubr.f32.mxu1 %v7907_v0  ;;  %v3674_v43 = vsub.f32 %v8285_v55, %v3673_v39  ;;  %v3665_v50 = vand.u32 4294901760, %v3664_v40 }
 0x3b9   : > { %6859 = vmatpush3.msra.mxu0 %v7681_v9  ;;  %6850 = vmatmul.mubr.f32.vlgmr.msra.gmra.mxu1 %v7921_v29 }
 0x3ba   : > { %6860 = vmatprep.subr.mxu0 %v7683_v10  ;;  %6871 = vmatprep.subr.mxu1 %v7752_v36  ;;  %v3675_v63 = vand.u32 4294901760, %v3674_v43 }
 0x3bb   : > { %6861 = vmatpush3.msra.mxu0 %v7683_v10  ;;  %6872 = vmatpush3.msra.mxu1 %v7752_v36 }
 0x3bc   : > { %6862 = vmatprep.subr.mxu0 %v7702_v17  ;;  %6873 = vmatprep.subr.mxu1 %v7754_v37 }
 0x3bd   : > { %6863 = vmatpush3.msra.mxu0 %v7702_v17  ;;  %6874 = vmatpush3.msra.mxu1 %v7754_v37 }
 0x3be   : > { %6864 = vmatprep.subr.mxu0 %v7722_v25  ;;  %6875 = vmatprep.subr.mxu1 %v7767_v42 }
 0x3bf   : > { %6865 = vmatpush3.msra.mxu0 %v7722_v25  ;;  %6876 = vmatpush3.msra.mxu1 %v7767_v42 }
 0x3c0   : > { %6866 = vmatprep.subr.mxu0 %v7743_v33  ;;  %6877 = vmatprep.subr.mxu1 %v7786_v48 }
 0x3c1   : > { %6867 = vmatpush3.msra.mxu0 %v7743_v33  ;;  %6878 = vmatpush3.msra.mxu1 %v7786_v48 }
 0x3c2   : > { %6868 = vmatprep.mubr.f32.mxu0 %v3665_v50  ;;  %6879 = vmatprep.subr.mxu1 %v7804_v54 }
 0x3c3   : > { %6890 = vmatprep.subr.mxu0 %v7690_v12  ;;  %6869 = vmatmul.mubr.f32.vlgmr.msra.gmra.mxu0 %v3675_v63 }
 0x3c4   : > { %6880 = vmatpush3.msra.mxu1 %v7804_v54  ;;  %6891 = vmatpush3.msra.mxu0 %v7690_v12 }
 0x3c5   : > { %6881 = vmatprep.subr.mxu1 %v7816_v58  ;;  %6892 = vmatprep.subr.mxu0 %v7693_v13 }
 0x3c6   : > { %6882 = vmatpush3.msra.mxu1 %v7816_v58  ;;  %6893 = vmatpush3.msra.mxu0 %v7693_v13 }
 0x3c7   : > { %6883 = vmatprep.subr.mxu1 %v7822_v60  ;;  %6894 = vmatprep.subr.mxu0 %v7696_v15 }
 0x3c8   : > { %6884 = vmatpush3.msra.mxu1 %v7822_v60  ;;  %6895 = vmatpush3.msra.mxu0 %v7696_v15 }
 0x3c9   : > { %6885 = vmatprep.subr.mxu1 %v7828_v61  ;;  %6896 = vmatprep.subr.mxu0 %v7705_v18 }
 0x3ca   : > { %6886 = vmatpush3.msra.mxu1 %v7828_v61  ;;  %6887 = vmatprep.mubr.f32.mxu1 %v8271_v51 }
 0x3cb   : > { %6897 = vmatpush3.msra.mxu0 %v7705_v18  ;;  %6888 = vmatmul.mubr.f32.vlgmr.msra.gmra.mxu1 %v8274_v59 }
 0x3cc   : > { %6898 = vmatprep.subr.mxu0 %v7728_v27  ;;  %6909 = vmatprep.subr.mxu1 %v7675_v3 }
 0x3cd   : > { %6899 = vmatpush3.msra.mxu0 %v7728_v27  ;;  %6910 = vmatpush3.msra.mxu1 %v7675_v3 }
 0x3ce   : > { %6900 = vmatprep.subr.mxu0 %v7773_v44  ;;  %6911 = vmatprep.subr.mxu1 %v7677_v4 }
 0x3cf   : > { %6901 = vmatpush3.msra.mxu0 %v7773_v44  ;;  %6912 = vmatpush3.msra.mxu1 %v7677_v4 }
 0x3d0   : > { %6902 = vmatprep.subr.mxu0 %v7776_v45  ;;  %6913 = vmatprep.subr.mxu1 %v7679_v5 }
 0x3d1   : > { %6903 = vmatpush3.msra.mxu0 %v7776_v45  ;;  %6914 = vmatpush3.msra.mxu1 %v7679_v5 }
 0x3d2   : > { %6904 = vmatprep.subr.mxu0 %v7782_v47  ;;  %6915 = vmatprep.subr.mxu1 %v7681_v9 }
 0x3d3   : > { %6905 = vmatpush3.msra.mxu0 %v7782_v47  ;;  %6906 = vmatprep.mubr.f32.mxu0 %v8280_v52 }
 0x3d4   : > { %6916 = vmatpush3.msra.mxu1 %v7681_v9  ;;  %6907 = vmatmul.mubr.f32.vlgmr.msra.gmra.mxu0 %v8285_v55 }
 0x3d5   : > { %6917 = vmatprep.subr.mxu1 %v7683_v10  ;;  %6928 = vmatprep.subr.mxu0 %v7711_v20 }
 0x3d6   : > { %6918 = vmatpush3.msra.mxu1 %v7683_v10  ;;  %6929 = vmatpush3.msra.mxu0 %v7711_v20 }
 0x3d7   : > { %6919 = vmatprep.subr.mxu1 %v7702_v17  ;;  %6930 = vmatprep.subr.mxu0 %v7714_v21 }
 0x3d8   : > { %6920 = vmatpush3.msra.mxu1 %v7702_v17  ;;  %6931 = vmatpush3.msra.mxu0 %v7714_v21 }
 0x3d9   : > { %6921 = vmatprep.subr.mxu1 %v7722_v25  ;;  %6932 = vmatprep.subr.mxu0 %v7717_v22 }
 0x3da   : > { %6922 = vmatpush3.msra.mxu1 %v7722_v25  ;;  %6933 = vmatpush3.msra.mxu0 %v7717_v22 }
 0x3db   : > { %6923 = vmatprep.subr.mxu1 %v7743_v33  ;;  %6934 = vmatprep.subr.mxu0 %v7725_v26 }
 0x3dc   : > { %6924 = vmatpush3.msra.mxu1 %v7743_v33  ;;  %6925 = vmatprep.mubr.f32.mxu1 %v3663_v56 }
 0x3dd   : > { %6935 = vmatpush3.msra.mxu0 %v7725_v26  ;;  %6926 = vmatmul.mubr.f32.vlgmr.msra.gmra.mxu1 %v3673_v39 }
 0x3de   : > { %6936 = vmatprep.subr.mxu0 %v7746_v34  ;;  %6947 = vmatprep.subr.mxu1 %v7675_v3 }
 0x3df   : > { %6937 = vmatpush3.msra.mxu0 %v7746_v34  ;;  %6948 = vmatpush3.msra.mxu1 %v7675_v3 }
 0x3e0   : > { %6938 = vmatprep.subr.mxu0 %v7789_v49  ;;  %6949 = vmatprep.subr.mxu1 %v7677_v4 }
 0x3e1   : > { %6939 = vmatpush3.msra.mxu0 %v7789_v49  ;;  %6950 = vmatpush3.msra.mxu1 %v7677_v4 }
 0x3e2   : > { %6940 = vmatprep.subr.mxu0 %v8693_v6  ;;  %6951 = vmatprep.subr.mxu1 %v7679_v5 }
 0x3e3   : > { %6941 = vmatpush3.msra.mxu0 %v8693_v6  ;;  %6952 = vmatpush3.msra.mxu1 %v7679_v5 }
 0x3e4   : > { %6942 = vmatprep.subr.mxu0 %v8694_v8  ;;  %6953 = vmatprep.subr.mxu1 %v7681_v9 }
 0x3e5   : > { %6943 = vmatpush3.msra.mxu0 %v8694_v8  ;;  %6944 = vmatprep.mubr.f32.mxu0 %v8271_v51 }
 0x3e6   : > { %6954 = vmatpush3.msra.mxu1 %v7681_v9  ;;  %6945 = vmatmul.mubr.f32.vlgmr.msra.gmra.mxu0 %v8274_v59 }
 0x3e7   : > { %6955 = vmatprep.subr.mxu1 %v7683_v10  ;;  %6963 = vmatprep.mubr.f32.mxu1 %v8271_v51 }
 0x3e8   : > { %6956 = vmatpush3.msra.mxu1 %v7683_v10  ;;  %6970 = vmatprep.mubr.f32.mxu0 %v8710_v62 }
 0x3e9   : > { %6957 = vmatprep.subr.mxu1 %v7702_v17 }
 0x3ea   : > { %6958 = vmatpush3.msra.mxu1 %v7702_v17 }
 0x3eb   : > { %6959 = vmatprep.subr.mxu1 %v7722_v25 }
 0x3ec   : > { %6960 = vmatpush3.msra.mxu1 %v7722_v25 }
 0x3ed   : > { %6961 = vmatprep.subr.mxu1 %v7743_v33 }
 0x3ee   : > { %6962 = vmatpush3.msra.mxu1 %v7743_v33 }
 0x3ef   : > { %6964 = vmatmul.mubr.f32.vlgmr.msra.gmra.mxu1 %v8274_v59 }
 0x3f0   : > { %6977 = vmatprep.mubr.f32.mxu1 %v7907_v0 }
 0x466   : > { %v6816_v23 = vpop.f32.mrf.mxu0 }
 0x468   : > { %v3147_v19 = vpop.f32.mrf.mxu0 }
 0x46b   : > { %v6830_v41 = vpop.f32.mrf.mxu0 }
 0x46d   : > { %v3320_v11 = vpop.f32.mrf.mxu0 }
 0x46e   : > { %v6823_v46 = vpop.f32.mrf.mxu1 }
 0x46f   : > { %v3245_v57 = vadd.f32 %v6823_v46, %v6816_v23 }
 0x470   : > { %v3238_v32 = vpop.f32.mrf.mxu1 }
 0x471   : > { %v3328_v24 = vadd.f32 %v6830_v41, %v3245_v57  ;;  %v3239_v30 = vadd.f32 %v3238_v32, %v3147_v19  ;;  %v6844_v35 = vpop.f32.mrf.mxu0 }
 0x473   : > { %v3321_v7 = vadd.f32 %v3320_v11, %v3239_v30  ;;  %v3487_v51 = vpop.f32.mrf.mxu0 }
 0x474   : > { %v6837_v14 = vpop.f32.mrf.mxu1 }
 0x475   : > { %v3411_v31 = vadd.f32 %v6837_v14, %v3328_v24 }
 0x476   : > { %v3402_v16 = vpop.f32.mrf.mxu1 }
 0x477   : > { %v3494_v52 = vadd.f32 %v6844_v35, %v3411_v31  ;;  %v3403_v55 = vadd.f32 %v3402_v16, %v3321_v7 }
 0x479   : > { %v3488_v59 = vadd.f32 %v3487_v51, %v3403_v55  ;;  %v6851_v56 = vpop.f32.mrf.mxu1 }
 0x47a   : > { %v8405_v39 = vadd.f32 %v6851_v56, %v3494_v52 }
 0x47b   : > { %v3566_v40 = vpop.f32.mrf.mxu1 }
 0x47c   : > { %8711 = vst [vmem:[#allocation19_spill] sm:$0xff] %v8405_v39  ;;  %v8409_v63 = vadd.f32 %v3566_v40, %v3488_v59 }
 0x47e   : > { %8713 = vst [vmem:[#allocation20_spill] sm:$0xff] %v8409_v63 }
 0x483   : > { %v6870_v41 = vpop.f32.mrf.mxu0 }
 0x485   : > { %v3667_v46 = vpop.f32.mrf.mxu0 }
 0x48b   : > { %v6889_v11 = vpop.f32.mrf.mxu1 }
 0x48c   : > { %v3795_v35 = vadd.f32 %v6889_v11, %v6870_v41 }
 0x48d   : > { %v3788_v32 = vpop.f32.mrf.mxu1 }
 0x48e   : > { %v3789_v14 = vadd.f32 %v3788_v32, %v3667_v46  ;;  %v7244_v32 = vld [vmem:[%s7653_s8] sm:$0xff] }
 0x494   : > { %v6908_v57 = vpop.f32.mrf.mxu0 }
 0x495   : > { %v3890_v31 = vadd.f32 %v6908_v57, %v3795_v35 }
 0x496   : > { %v3882_v24 = vpop.f32.mrf.mxu0 }
 0x497   : > { %v3883_v51 = vadd.f32 %v3882_v24, %v3789_v14  ;;  %v7245_v24 = vld [vmem:[%s7661_s27] sm:$0xff] }
 0x49d   : > { %v6927_v30 = vpop.f32.mrf.mxu1 }
 0x49e   : > { %v3979_v52 = vadd.f32 %v6927_v30, %v3890_v31  ;;  %v4674_v30 = vmul.f32 %v7245_v24, %v7244_v32 }
 0x49f   : > { %v3970_v16 = vpop.f32.mrf.mxu1 }
 0x4a0   : > { %v3971_v59 = vadd.f32 %v3970_v16, %v3883_v51  ;;  %v4677_v14 = vsel %vm302_vm0, %v4674_v30, 0 }
 0x4a1   : > { %v8423_v31 = vand.u32 4294901760, %v4677_v14 }
 0x4a3   : > { %v8432_v51 = vsub.f32 %v4677_v14, %v8423_v31 }
 0x4a6   : > { %v6946_v7 = vpop.f32.mrf.mxu0 }
 0x4a7   : > { %v4080_v56 = vadd.f32 %v6946_v7, %v3979_v52 }
 0x4a8   : > { %v4073_v55 = vpop.f32.mrf.mxu0 }
 0x4a9   : > { %v4074_v50 = vadd.f32 %v4073_v55, %v3971_v59  ;;  %v4757_v55 = vand.u32 4294901760, %v8432_v51 }
 0x4af   : > { %v6965_v40 = vpop.f32.mrf.mxu1 }
 0x4b0   : > { %v4165_v19 = vadd.f32 %v6965_v40, %v4080_v56  ;;  %v8721_v40 = vld [vmem:[#allocation25_spill] sm:$0xff] }
 0x4b1   : > { %v4158_v23 = vpop.f32.mrf.mxu1 }
 0x4b2   : > { %v4197_v63 = vand.u32 4294901760, %v4165_v19  ;;  %v4159_v43 = vadd.f32 %v4158_v23, %v4074_v50  ;;  %v7246_v50 = vld [vmem:[%s7653_s8 + $0x8] sm:$0xff] }
 0x4b3   : > { %v7247_v23 = vld [vmem:[%s7661_s27 + $0x8] sm:$0xff] }
 0x4b4   : > { %v4285_v39 = vsub.f32 %v4165_v19, %v4197_v63  ;;  %v4200_v62 = vand.u32 4294901760, %v4159_v43  ;;  %6966 = vmatprep.subr.mxu0 %v4197_v63  ;;  %v4675_v19 = vmul.f32 %v7247_v23, %v7246_v50  ;;  %v8725_v50 = vld [vmem:[#allocation28_spill] sm:$0xff] }
 0x4b5   : > { %6967 = vmatpush3.msra.mxu0 %v4197_v63  ;;  %v5782_v23 = vadd.f32 0.0001, %v8725_v50 }
 0x4b6   : > { %v4292_v41 = vsub.f32 %v4159_v43, %v4200_v62  ;;  %6968 = vmatprep.subr.mxu0 %v4200_v62  ;;  %v4286_v46 = vand.u32 4294901760, %v4285_v39 }
 0x4b7   : > { %6969 = vmatpush3.msra.mxu0 %v4200_v62 }
 0x4b8   : > { %6980 = vmatprep.subr.mxu0 %v4285_v39  ;;  %6971 = vmatmul.mubr.f32.vlgmr.msra.gmra.mxu0 %v7931_v28  ;;  %v4287_v11 = vsub.f32 %v4285_v39, %v4286_v46  ;;  %v4293_v57 = vand.u32 4294901760, %v4292_v41 }
 0x4b9   : > { %6981 = vmatpush3.msra.mxu0 %v4285_v39  ;;  %6984 = vmatprep.mubr.f32.mxu0 %v7910_v1  ;;  %v4680_v39 = vsel %vm302_vm0, %v4675_v19, 0 }
 0x4ba   : > { %6982 = vmatprep.subr.mxu0 %v4292_v41  ;;  %v4288_v35 = vand.u32 4294901760, %v4287_v11  ;;  %v4294_v43 = vsub.f32 %v4292_v41, %v4293_v57  ;;  %v8426_v16 = vand.u32 4294901760, %v4680_v39  ;;  %v8722_v11 = vld [vmem:[#allocation20_spill] sm:$0xff] }
 0x4bb   : > { %6983 = vmatpush3.msra.mxu0 %v4292_v41  ;;  %v5783_v41 = vadd.f32 0.0001, %v8721_v40 }
 0x4bc   : > { %6973 = vmatprep.subr.mxu1 %v4288_v35  ;;  %6994 = vmatprep.subr.mxu0 %v4286_v46  ;;  %v4295_v7 = vand.u32 4294901760, %v4294_v43  ;;  %v8437_v52 = vsub.f32 %v4680_v39, %v8426_v16 }
 0x4bd   : > { %6974 = vmatpush3.msra.mxu1 %v4288_v35  ;;  %6985 = vmatmul.mubr.f32.vlgmr.msra.gmra.mxu0 %v7924_v38 }
 0x4be   : > { %6995 = vmatpush3.msra.mxu0 %v4286_v46  ;;  %6975 = vmatprep.subr.mxu1 %v4295_v7  ;;  %v4767_v59 = vand.u32 4294901760, %v8437_v52 }
 0x4bf   : > { %6996 = vmatprep.subr.mxu0 %v4293_v57  ;;  %6976 = vmatpush3.msra.mxu1 %v4295_v7 }
 0x4c0   : > { %6997 = vmatpush3.msra.mxu0 %v4293_v57  ;;  %6978 = vmatmul.mubr.f32.vlgmr.msra.gmra.mxu1 %v7921_v29  ;;  %v8723_v57 = vld [vmem:[#allocation24_spill] sm:$0xff] }
 0x4c1   : > { %6987 = vmatprep.subr.mxu1 %v4197_v63  ;;  %6998 = vmatprep.mubr.f32.mxu0 %v7907_v0  ;;  %v8724_v32 = vsub.f32 %v8722_v11, %v8723_v57 }
 0x4c2   : > { %7008 = vmatprep.subr.mxu0 %v7675_v3  ;;  %6988 = vmatpush3.msra.mxu1 %v4197_v63 }
 0x4c3   : > { %6999 = vmatmul.mubr.f32.vlgmr.msra.gmra.mxu0 %v7921_v29  ;;  %6989 = vmatprep.subr.mxu1 %v4200_v62 }
 0x4c4   : > { %7009 = vmatpush3.msra.mxu0 %v7675_v3  ;;  %6990 = vmatpush3.msra.mxu1 %v4200_v62 }
 0x4c5   : > { %7010 = vmatprep.subr.mxu0 %v7677_v4  ;;  %6991 = vmatprep.mubr.f32.mxu1 %v7914_v2 }
 0x4c6   : > { %7011 = vmatpush3.msra.mxu0 %v7677_v4  ;;  %6992 = vmatmul.mubr.f32.vlgmr.msra.gmra.mxu1 %v7927_v53 }
 0x4c7   : > { %7001 = vmatprep.subr.mxu1 %v4197_v63  ;;  %7012 = vmatprep.subr.mxu0 %v7679_v5 }
 0x4c8   : > { %7002 = vmatpush3.msra.mxu1 %v4197_v63  ;;  %7013 = vmatpush3.msra.mxu0 %v7679_v5  ;;  %v4758_v63 = vsub.f32 %v8432_v51, %v4757_v55 }
 0x4c9   : > { %7003 = vmatprep.subr.mxu1 %v4200_v62  ;;  %7014 = vmatprep.subr.mxu0 %v7681_v9 }
 0x4ca   : > { %7004 = vmatpush3.msra.mxu1 %v4200_v62  ;;  %7005 = vmatprep.mubr.f32.mxu1 %v7907_v0  ;;  %v4768_v62 = vsub.f32 %v8437_v52, %v4767_v59  ;;  %v4759_v56 = vand.u32 4294901760, %v4758_v63 }
 0x4cb   : > { %7015 = vmatpush3.msra.mxu0 %v7681_v9  ;;  %7006 = vmatmul.mubr.f32.vlgmr.msra.gmra.mxu1 %v7921_v29 }
 0x4cc   : > { %7016 = vmatprep.subr.mxu0 %v7683_v10  ;;  %7027 = vmatprep.subr.mxu1 %v7752_v36 }
 0x4cd   : > { %7017 = vmatpush3.msra.mxu0 %v7683_v10  ;;  %7028 = vmatpush3.msra.mxu1 %v7752_v36  ;;  %v4769_v36 = vand.u32 4294901760, %v4768_v62 }
 0x4ce   : > { %7018 = vmatprep.subr.mxu0 %v7702_v17  ;;  %7029 = vmatprep.subr.mxu1 %v7754_v37 }
 0x4cf   : > { %7019 = vmatpush3.msra.mxu0 %v7702_v17  ;;  %7030 = vmatpush3.msra.mxu1 %v7754_v37 }
 0x4d0   : > { %7020 = vmatprep.subr.mxu0 %v7722_v25  ;;  %7031 = vmatprep.subr.mxu1 %v7767_v42 }
 0x4d1   : > { %7021 = vmatpush3.msra.mxu0 %v7722_v25  ;;  %7032 = vmatpush3.msra.mxu1 %v7767_v42 }
 0x4d2   : > { %7022 = vmatprep.subr.mxu0 %v7743_v33  ;;  %7033 = vmatprep.subr.mxu1 %v7786_v48 }
 0x4d3   : > { %7023 = vmatpush3.msra.mxu0 %v7743_v33  ;;  %7034 = vmatpush3.msra.mxu1 %v7786_v48 }
 0x4d4   : > { %7024 = vmatprep.mubr.f32.mxu0 %v4759_v56  ;;  %7035 = vmatprep.subr.mxu1 %v7804_v54 }
 0x4d5   : > { %7046 = vmatprep.subr.mxu0 %v7690_v12  ;;  %7025 = vmatmul.mubr.f32.vlgmr.msra.gmra.mxu0 %v4769_v36 }
 0x4d6   : > { %7036 = vmatpush3.msra.mxu1 %v7804_v54  ;;  %7047 = vmatpush3.msra.mxu0 %v7690_v12  ;;  %v8717_v54 = vld [vmem:[#allocation19_spill] sm:$0xff] }
 0x4d7   : > { %7037 = vmatprep.subr.mxu1 %v7816_v58  ;;  %7048 = vmatprep.subr.mxu0 %v7693_v13 }
 0x4d8   : > { %7038 = vmatpush3.msra.mxu1 %v7816_v58  ;;  %7049 = vmatpush3.msra.mxu0 %v7693_v13  ;;  %v8718_v58 = vld [vmem:[#allocation16_spill] sm:$0xff] }
 0x4d9   : > { %7039 = vmatprep.subr.mxu1 %v7822_v60  ;;  %7050 = vmatprep.subr.mxu0 %v7696_v15 }
 0x4da   : > { %7040 = vmatpush3.msra.mxu1 %v7822_v60  ;;  %7051 = vmatpush3.msra.mxu0 %v7696_v15  ;;  %v8719_v60 = vsub.f32 %v8717_v54, %v8718_v58 }
 0x4db   : > { %7041 = vmatprep.subr.mxu1 %v7828_v61  ;;  %7052 = vmatprep.subr.mxu0 %v7705_v18 }
 0x4dc   : > { %7042 = vmatpush3.msra.mxu1 %v7828_v61  ;;  %7043 = vmatprep.mubr.f32.mxu1 %v8423_v31 }
 0x4dd   : > { %7053 = vmatpush3.msra.mxu0 %v7705_v18  ;;  %7044 = vmatmul.mubr.f32.vlgmr.msra.gmra.mxu1 %v8426_v16 }
 0x4de   : > { %7054 = vmatprep.subr.mxu0 %v7728_v27  ;;  %7065 = vmatprep.subr.mxu1 %v7675_v3 }
 0x4df   : > { %7055 = vmatpush3.msra.mxu0 %v7728_v27  ;;  %7066 = vmatpush3.msra.mxu1 %v7675_v3 }
 0x4e0   : > { %7056 = vmatprep.subr.mxu0 %v7773_v44  ;;  %7067 = vmatprep.subr.mxu1 %v7677_v4 }
 0x4e1   : > { %7057 = vmatpush3.msra.mxu0 %v7773_v44  ;;  %7068 = vmatpush3.msra.mxu1 %v7677_v4 }
 0x4e2   : > { %7058 = vmatprep.subr.mxu0 %v7776_v45  ;;  %7069 = vmatprep.subr.mxu1 %v7679_v5 }
 0x4e3   : > { %7059 = vmatpush3.msra.mxu0 %v7776_v45  ;;  %7070 = vmatpush3.msra.mxu1 %v7679_v5 }
 0x4e4   : > { %7060 = vmatprep.subr.mxu0 %v7782_v47  ;;  %7071 = vmatprep.subr.mxu1 %v7681_v9 }
 0x4e5   : > { %7061 = vmatpush3.msra.mxu0 %v7782_v47  ;;  %7062 = vmatprep.mubr.f32.mxu0 %v8432_v51  ;;  %v8716_v47 = vld [vmem:[#allocation21_spill] sm:$0xff] }
 0x4e6   : > { %7072 = vmatpush3.msra.mxu1 %v7681_v9  ;;  %7063 = vmatmul.mubr.f32.vlgmr.msra.gmra.mxu0 %v8437_v52 }
 0x4e7   : > { %7073 = vmatprep.subr.mxu1 %v7683_v10  ;;  %7084 = vmatprep.subr.mxu0 %v7711_v20 }
 0x4e8   : > { %7074 = vmatpush3.msra.mxu1 %v7683_v10  ;;  %7085 = vmatpush3.msra.mxu0 %v7711_v20 }
 0x4e9   : > { %7075 = vmatprep.subr.mxu1 %v7702_v17  ;;  %7086 = vmatprep.subr.mxu0 %v7714_v21 }
 0x4ea   : > { %7076 = vmatpush3.msra.mxu1 %v7702_v17  ;;  %7087 = vmatpush3.msra.mxu0 %v7714_v21 }
 0x4eb   : > { %7077 = vmatprep.subr.mxu1 %v7722_v25  ;;  %7088 = vmatprep.subr.mxu0 %v7717_v22 }
 0x4ec   : > { %7078 = vmatpush3.msra.mxu1 %v7722_v25  ;;  %7089 = vmatpush3.msra.mxu0 %v7717_v22 }
 0x4ed   : > { %7079 = vmatprep.subr.mxu1 %v7743_v33  ;;  %7090 = vmatprep.subr.mxu0 %v7725_v26 }
 0x4ee   : > { %7080 = vmatpush3.msra.mxu1 %v7743_v33  ;;  %7081 = vmatprep.mubr.f32.mxu1 %v4757_v55 }
 0x4ef   : > { %7091 = vmatpush3.msra.mxu0 %v7725_v26  ;;  %7082 = vmatmul.mubr.f32.vlgmr.msra.gmra.mxu1 %v4767_v59 }
 0x4f0   : > { %7092 = vmatprep.subr.mxu0 %v7746_v34  ;;  %7103 = vmatprep.subr.mxu1 %v7675_v3 }
 0x4f1   : > { %7093 = vmatpush3.msra.mxu0 %v7746_v34  ;;  %7104 = vmatpush3.msra.mxu1 %v7675_v3  ;;  %v8715_v3 = vld [vmem:[#allocation18_spill] sm:$0xff] }
 0x4f2   : > { %7094 = vmatprep.subr.mxu0 %v7789_v49  ;;  %7105 = vmatprep.subr.mxu1 %v7677_v4 }
 0x4f3   : > { %7095 = vmatpush3.msra.mxu0 %v7789_v49  ;;  %7106 = vmatpush3.msra.mxu1 %v7677_v4 }
 0x4f4   : > { %7096 = vmatprep.subr.mxu0 %v8693_v6  ;;  %7107 = vmatprep.subr.mxu1 %v7679_v5 }
 0x4f5   : > { %7097 = vmatpush3.msra.mxu0 %v8693_v6  ;;  %7108 = vmatpush3.msra.mxu1 %v7679_v5  ;;  %v8720_v6 = vld [vmem:[#allocation26_spill] sm:$0xff] }
 0x4f6   : > { %7098 = vmatprep.subr.mxu0 %v8694_v8  ;;  %7109 = vmatprep.subr.mxu1 %v7681_v9 }
 0x4f7   : > { %7099 = vmatpush3.msra.mxu0 %v8694_v8  ;;  %7100 = vmatprep.mubr.f32.mxu0 %v8423_v31 }
 0x4f8   : > { %7110 = vmatpush3.msra.mxu1 %v7681_v9  ;;  %7101 = vmatmul.mubr.f32.vlgmr.msra.gmra.mxu0 %v8426_v16 }
 0x4f9   : > { %7111 = vmatprep.subr.mxu1 %v7683_v10  ;;  %7119 = vmatprep.mubr.f32.mxu1 %v8423_v31 }
 0x4fa   : > { %7112 = vmatpush3.msra.mxu1 %v7683_v10  ;;  %7126 = vmatprep.mubr.f32.mxu0 %v8715_v3 }
 0x4fb   : > { %7113 = vmatprep.subr.mxu1 %v7702_v17 }
 0x4fc   : > { %7114 = vmatpush3.msra.mxu1 %v7702_v17 }
 0x4fd   : > { %7115 = vmatprep.subr.mxu1 %v7722_v25 }
 0x4fe   : > { %7116 = vmatpush3.msra.mxu1 %v7722_v25 }
 0x4ff   : > { %7117 = vmatprep.subr.mxu1 %v7743_v33 }
 0x500   : > { %7118 = vmatpush3.msra.mxu1 %v7743_v33 }
 0x501   : > { %7120 = vmatmul.mubr.f32.vlgmr.msra.gmra.mxu1 %v8426_v16 }
 0x502   : > { %7133 = vmatprep.mubr.f32.mxu1 %v7907_v0 }
 0x578   : > { %v6972_v4 = vpop.f32.mrf.mxu0 }
 0x57a   : > { %v4241_v5 = vpop.f32.mrf.mxu0 }
 0x57d   : > { %v6986_v9 = vpop.f32.mrf.mxu0 }
 0x57f   : > { %v4414_v12 = vpop.f32.mrf.mxu0 }
 0x580   : > { %v6979_v10 = vpop.f32.mrf.mxu1 }
 0x581   : > { %v4339_v13 = vadd.f32 %v6979_v10, %v6972_v4 }
 0x582   : > { %v4332_v15 = vpop.f32.mrf.mxu1 }
 0x583   : > { %v4422_v17 = vadd.f32 %v6986_v9, %v4339_v13  ;;  %v4333_v18 = vadd.f32 %v4332_v15, %v4241_v5  ;;  %v7000_v20 = vpop.f32.mrf.mxu0 }
 0x585   : > { %v4415_v21 = vadd.f32 %v4414_v12, %v4333_v18  ;;  %v4581_v27 = vpop.f32.mrf.mxu0 }
 0x586   : > { %v6993_v22 = vpop.f32.mrf.mxu1 }
 0x587   : > { %v4505_v25 = vadd.f32 %v6993_v22, %v4422_v17 }
 0x588   : > { %v4496_v26 = vpop.f32.mrf.mxu1 }
 0x589   : > { %v4588_v33 = vadd.f32 %v7000_v20, %v4505_v25  ;;  %v4497_v34 = vadd.f32 %v4496_v26, %v4415_v21 }
 0x58b   : > { %v4582_v37 = vadd.f32 %v4581_v27, %v4497_v34  ;;  %v7007_v42 = vpop.f32.mrf.mxu1 }
 0x58c   : > { %v4667_v44 = vadd.f32 %v7007_v42, %v4588_v33 }
 0x58d   : > { %v4660_v45 = vpop.f32.mrf.mxu1 }
 0x58e   : > { %v4673_v48 = vsub.f32 %v4667_v44, %v8716_v47  ;;  %v4661_v49 = vadd.f32 %v4660_v45, %v4582_v37 }
 0x590   : > { %v5785_v61 = vadd.f32 %v4673_v48, %v8719_v60  ;;  %v4672_v8 = vsub.f32 %v4661_v49, %v8720_v6 }
 0x592   : > { %v5787_v46 = vadd.f32 0.0009, %v5785_v61  ;;  %v5784_v24 = vadd.f32 %v4672_v8, %v8724_v32  ;;  %v8726_v32 = vld [vmem:[#allocation22_spill] sm:$0xff] }
 0x594   : > { %v8566_v30 = vmul.f32 %v5787_v46, %v5783_v41  ;;  %v5786_v19 = vadd.f32 0.0009, %v5784_v24 }
 0x595   : > { %v7026_v43 = vpop.f32.mrf.mxu0 }
 0x596   : > { %v8569_v35 = vmul.f32 %v5786_v19, %v5782_v23  ;;  %7240 = vrcp.f32 %v8566_v30 }
 0x597   : > { %v4761_v7 = vpop.f32.mrf.mxu0 }
 0x598   : > { %7242 = vrcp.f32 %v8569_v35 }
 0x59d   : > { %v7045_v14 = vpop.f32.mrf.mxu1 }
 0x59e   : > { %v4889_v52 = vadd.f32 %v7045_v14, %v7026_v43  ;;  %v8727_v43 = vld [vmem:[#allocation27_spill] sm:$0xff]  ;;  %v8728_v14 = vld [vmem:[#allocation17_spill] sm:$0xff] }
 0x59f   : > { %v4882_v31 = vpop.f32.mrf.mxu1 }
 0x5a0   : > { %v4883_v59 = vadd.f32 %v4882_v31, %v4761_v7 }
 0x5a3   : > { %v7241_v54 = vpop.eup %7240 }
 0x5a4   : > { %v5793_v40 = vmul.f32 %v7241_v54, %v8566_v30  ;;  %v8729_v30 = vld [vmem:[#allocation23_spill] sm:$0xff] }
 0x5a5   : > { %v7243_v61 = vpop.eup %7242 }
 0x5a6   : > { %v7064_v39 = vpop.f32.mrf.mxu0  ;;  %v5792_v57 = vmul.f32 %v7243_v61, %v8569_v35  ;;  %v5795_v23 = vsub.f32 2.0, %v5793_v40 }
 0x5a7   : > { %v4984_v63 = vadd.f32 %v7064_v39, %v4889_v52  ;;  %v5773_v39 = vadd.f32 0.0001, %v8728_v14  ;;  %v5772_v52 = vadd.f32 0.0001, %v8729_v30 }
 0x5a8   : > { %v4976_v16 = vpop.f32.mrf.mxu0  ;;  %v5794_v31 = vsub.f32 2.0, %v5792_v57 }
 0x5a9   : > { %v4977_v56 = vadd.f32 %v4976_v16, %v4883_v59  ;;  %v5797_v59 = vmul.f32 %v7241_v54, %v5795_v23 }
 0x5af   : > { %v7083_v51 = vpop.f32.mrf.mxu1 }
 0x5b0   : > { %v5073_v36 = vadd.f32 %v7083_v51, %v4984_v63 }
 0x5b1   : > { %v5064_v62 = vpop.f32.mrf.mxu1 }
 0x5b2   : > { %v5065_v4 = vadd.f32 %v5064_v62, %v4977_v56  ;;  %v5796_v56 = vmul.f32 %v7243_v61, %v5794_v31 }
 0x5b8   : > { %v7102_v55 = vpop.f32.mrf.mxu0 }
 0x5b9   : > { %v5174_v5 = vadd.f32 %v7102_v55, %v5073_v36 }
 0x5ba   : > { %v5167_v3 = vpop.f32.mrf.mxu0 }
 0x5bb   : > { %v5168_v10 = vadd.f32 %v5167_v3, %v5065_v4 }
 0x5c1   : > { %v7121_v9 = vpop.f32.mrf.mxu1 }
 0x5c2   : > { %v5259_v12 = vadd.f32 %v7121_v9, %v5174_v5 }
 0x5c3   : > { %v5252_v13 = vpop.f32.mrf.mxu1 }
 0x5c4   : > { %v5291_v15 = vand.u32 4294901760, %v5259_v12  ;;  %v5253_v17 = vadd.f32 %v5252_v13, %v5168_v10 }
 0x5c6   : > { %v5379_v18 = vsub.f32 %v5259_v12, %v5291_v15  ;;  %v5294_v20 = vand.u32 4294901760, %v5253_v17  ;;  %7122 = vmatprep.subr.mxu0 %v5291_v15 }
 0x5c7   : > { %7123 = vmatpush3.msra.mxu0 %v5291_v15 }
 0x5c8   : > { %v5386_v21 = vsub.f32 %v5253_v17, %v5294_v20  ;;  %7124 = vmatprep.subr.mxu0 %v5294_v20  ;;  %v5380_v22 = vand.u32 4294901760, %v5379_v18 }
 0x5c9   : > { %7125 = vmatpush3.msra.mxu0 %v5294_v20 }
 0x5ca   : > { %7136 = vmatprep.subr.mxu0 %v5379_v18  ;;  %7127 = vmatmul.mubr.f32.vlgmr.msra.gmra.mxu0 %v7931_v28  ;;  %v5381_v25 = vsub.f32 %v5379_v18, %v5380_v22  ;;  %v5387_v26 = vand.u32 4294901760, %v5386_v21 }
 0x5cb   : > { %7137 = vmatpush3.msra.mxu0 %v5379_v18  ;;  %7140 = vmatprep.mubr.f32.mxu0 %v7910_v1 }
 0x5cc   : > { %7138 = vmatprep.subr.mxu0 %v5386_v21  ;;  %v5382_v27 = vand.u32 4294901760, %v5381_v25  ;;  %v5388_v33 = vsub.f32 %v5386_v21, %v5387_v26 }
 0x5cd   : > { %7139 = vmatpush3.msra.mxu0 %v5386_v21 }
 0x5ce   : > { %7129 = vmatprep.subr.mxu1 %v5382_v27  ;;  %7150 = vmatprep.subr.mxu0 %v5380_v22  ;;  %v5389_v34 = vand.u32 4294901760, %v5388_v33 }
 0x5cf   : > { %7130 = vmatpush3.msra.mxu1 %v5382_v27  ;;  %7141 = vmatmul.mubr.f32.vlgmr.msra.gmra.mxu0 %v7924_v38 }
 0x5d0   : > { %7151 = vmatpush3.msra.mxu0 %v5380_v22  ;;  %7131 = vmatprep.subr.mxu1 %v5389_v34 }
 0x5d1   : > { %7152 = vmatprep.subr.mxu0 %v5387_v26  ;;  %7132 = vmatpush3.msra.mxu1 %v5389_v34 }
 0x5d2   : > { %7153 = vmatpush3.msra.mxu0 %v5387_v26  ;;  %7134 = vmatmul.mubr.f32.vlgmr.msra.gmra.mxu1 %v7921_v29 }
 0x5d3   : > { %7143 = vmatprep.subr.mxu1 %v5291_v15  ;;  %7147 = vmatprep.mubr.f32.mxu1 %v7914_v2 }
 0x5d4   : > { %7144 = vmatpush3.msra.mxu1 %v5291_v15  ;;  %7154 = vmatprep.mubr.f32.mxu0 %v7907_v0 }
 0x5d5   : > { %7145 = vmatprep.subr.mxu1 %v5294_v20  ;;  %7155 = vmatmul.mubr.f32.vlgmr.msra.gmra.mxu0 %v7921_v29 }
 0x5d6   : > { %7146 = vmatpush3.msra.mxu1 %v5294_v20 }
 0x5d7   : > { %7148 = vmatmul.mubr.f32.vlgmr.msra.gmra.mxu1 %v7927_v53  ;;  %7157 = vmatprep.subr.mxu1 %v5291_v15 }
 0x5d8   : > { %7158 = vmatpush3.msra.mxu1 %v5291_v15  ;;  %7161 = vmatprep.mubr.f32.mxu1 %v7907_v0 }
 0x5d9   : > { %7159 = vmatprep.subr.mxu1 %v5294_v20 }
 0x5da   : > { %7160 = vmatpush3.msra.mxu1 %v5294_v20 }
 0x5db   : > { %7162 = vmatmul.mubr.f32.vlgmr.msra.gmra.mxu1 %v7921_v29 }
 0x68a   : > { %v7128_v1 = vpop.f32.mrf.mxu0 }
 0x68c   : > { %v5335_v2 = vpop.f32.mrf.mxu0 }
 0x68f   : > { %v7142_v38 = vpop.f32.mrf.mxu0 }
 0x691   : > { %v5508_v42 = vpop.f32.mrf.mxu0 }
 0x692   : > { %v7135_v28 = vpop.f32.mrf.mxu1 }
 0x693   : > { %v5433_v37 = vadd.f32 %v7135_v28, %v7128_v1 }
 0x694   : > { %v5426_v44 = vpop.f32.mrf.mxu1 }
 0x695   : > { %v5516_v53 = vadd.f32 %v7142_v38, %v5433_v37  ;;  %v5427_v45 = vadd.f32 %v5426_v44, %v5335_v2  ;;  %v7156_v0 = vpop.f32.mrf.mxu0 }
 0x697   : > { %v5509_v47 = vadd.f32 %v5508_v42, %v5427_v45  ;;  %v7149_v48 = vpop.f32.mrf.mxu1  ;;  %v5675_v6 = vpop.f32.mrf.mxu0 }
 0x698   : > { %v5599_v49 = vadd.f32 %v7149_v48, %v5516_v53 }
 0x699   : > { %v5590_v58 = vpop.f32.mrf.mxu1 }
 0x69a   : > { %v5682_v29 = vadd.f32 %v7156_v0, %v5599_v49  ;;  %v5591_v60 = vadd.f32 %v5590_v58, %v5509_v47 }
 0x69b   : > { %v7163_v8 = vpop.f32.mrf.mxu1 }
 0x69c   : > { %v5676_v41 = vadd.f32 %v5675_v6, %v5591_v60  ;;  %v5761_v46 = vadd.f32 %v7163_v8, %v5682_v29 }
 0x69d   : > { %v5754_v11 = vpop.f32.mrf.mxu1 }
 0x69e   : > { %v5767_v24 = vsub.f32 %v5761_v46, %v8726_v32  ;;  %v5755_v50 = vadd.f32 %v5754_v11, %v5676_v41 }
 0x6a0   : > { %v5775_v19 = vmul.f32 2.0, %v5767_v24  ;;  %v5766_v7 = vsub.f32 %v5755_v50, %v8727_v43 }
 0x6a2   : > { %v5777_v16 = vadd.f32 0.0009, %v5775_v19  ;;  %v5774_v51 = vmul.f32 2.0, %v5766_v7 }
 0x6a4   : > { %v5779_v55 = vmul.f32 %v5777_v16, %v5773_v39  ;;  %v5776_v63 = vadd.f32 0.0009, %v5774_v51 }
 0x6a6   : > { %v5799_v35 = vmul.f32 %v5797_v59, %v5779_v55  ;;  %v5778_v62 = vmul.f32 %v5776_v63, %v5772_v52 }
 0x6a8   : > { %v5801_v36 = vsub.f32 1.0, %v5799_v35  ;;  %v5798_v3 = vmul.f32 %v5796_v56, %v5778_v62 }
 0x6aa   : > { %v5803_v4 = vmul.f32 0.5, %v5801_v36  ;;  %v5800_v5 = vsub.f32 1.0, %v5798_v3 }
 0x6ac   : > { %v5805_v9 = vmax.f32 %v5803_v4, 0.0  ;;  %v5802_v10 = vmul.f32 0.5, %v5800_v5 }
 0x6ae   : > { %v5807_v12 = vmin.f32 %v5805_v9, 1.0  ;;  %v5804_v13 = vmax.f32 %v5802_v10, 0.0 }
 0x6b0   : > { %v5806_v15 = vmin.f32 %v5804_v13, 1.0  ;;  %5809 = vst.msk [vmem:[%s284_s30 + $0x8] sm:$0xff] %vm302_vm0, %v5807_v12 }
 0x6b2   : > { %5808 = vst.msk [vmem:[%s284_s30] sm:$0xff] %vm302_vm0, %v5806_v15 }
 0x6b3   : > { %7369 = shalt.err (!%p7366_p4)
}
 0x6b4   : > { %s7370_s9 = scalar_lea.hbm %s8594_s25, 256  ;;  %s7374_s8 = scalar_lea.hbm %s8645_s4, 512 }
 0x6b5   : > { %p7371_p5 = scmp.ne.s32.totalorder %s8594_s25, %s7370_s9  ;;  %p7375_p2 = scmp.lt.s32.totalorder %s8594_s25, %s8645_s4 }
 0x6b6   : > { %p7376_p6 = scmp.lt.s32.totalorder %s7374_s8, %s7370_s9 }
 0x6b7   : > { %p7372_p7 = pnand %p7371_p5, %p8730_p10 }
 0x6b8   : > { %p7377_p12 = por %p7376_p6, %p7375_p2 }
 0x6b9   : > { %p7373_p8 = pneg %p7372_p7 }
 0x6bb   : > { %p7378_p0 = pnand %p7377_p12, %p7373_p8 }
 0x6bd   : > { %7381 = shalt.err (!%p7378_p0)
}
 0x6be   : > { %s7441_s27 = smov 128   ;;  %s7442_s21 = smov 8  }
 0x6bf   : > { %7176 = dma.vmem_to_hbm [thread:$0]  (%p8730_p10), %s8596_s6, 256, %s8594_s25, %s5811_s19, %s7441_s27, %s7441_s27, %s7442_s21  }
 0x6c0 PF: > { %s5839_s30 = sand.u32 1, %s7420_s15   ;;  %p8731_p3 = scmp.ne.s32.totalorder %s8673_s22, 0 }
 0x6c1   : > { %p8732_p11 = scmp.ge.s32.totalorder %s7432_s18, 2  ;;  %s5840_s10 = scalar_lea.sflag [#allocation4], %s5839_s30 }
 0x6c3   : > { %p7193_p9 = pnand %p8732_p11, %p8731_p3 }
 0x6c5   : > { %p7194_p13 = pneg %p7193_p9 }
 0x6c7   : > { %7415 = dma.done.wait (%p7194_p13), %s5840_s10, 256  }
 0x6c8   : > { %7417 = vsyncadd (%p7194_p13), %s5840_s10, 4294967040  ;;  %p21_p1 = scmp.ge.s32.totalorder %s7546_s11, 4   ;;  %s8733_s15 = smov %s7424_s16 }
 0x6c9   : > { %s8734_s16 = smov %s7428_s17  ;;  %s8735_s17 = smov %s7562_s20 }
 0x6ca   : > { %s8736_s18 = smov %s7546_s11  ;;  %23 = sbr.rel (!%p21_p1) target bundleno = 10 (0xa), region = 102 }
 0x6cf   :  { %5845 = vsyncpa [#allocation3], 1 }
 0x6d0   :  { %5847 = vsyncpa [#allocation3 + $0x1], 1 }
 0x6d1   :  { %5848 = vsyncpa [#allocation6], 1 }
 0x6d2   :  { %5850 = vsyncpa [#allocation6 + $0x1], 1 }
 0x6d3   :  { %5851 = vsyncpa [#allocation9], 1 }
 0x6d4   :  { %5852 = vsyncpa [#allocation4], 1 }
 0x6d5   :  { %5854 = vsyncpa [#allocation4 + $0x1], 1 }

</bundles_post_ra>
